<compile_context>
chip_gen: v5e
topology: v5e:2x2
jax: 0.10.0
libtpu: 0.0.40
codegen_flags: <defaults>
</compile_context>

<pallas_src>
import functools

import jax
import jax.numpy as jnp
import numpy as np
from jax.experimental import pallas as pl
from jax.experimental.pallas import tpu as pltpu


def mult_filters(filters, width):
    return max(3, int(filters * width))


_BN_EPS = 1e-3  # matches nn.BatchNorm2d(eps=0.001)

# All grids are 1-D and independent across steps -> "parallel" (lets megacore
# parts shard steps across TensorCores).  64 MiB scoped VMEM is within every
# part's physical budget (v5e/v6e: 128 MiB, v7x: 64 MiB); actual usage per
# step is far below it with the reduced tap materialization + bf16 operands.
_COMPILER_PARAMS = pltpu.CompilerParams(
    dimension_semantics=("parallel",),
    vmem_limit_bytes=64 * 1024 * 1024,
)


# ----------------------------- small helpers -------------------------------

def _cdiv(a, b):
    return -(-a // b)


def _tile_rows(m, target):
    """Pick an M-tile (multiple of 8) and the padded row count."""
    if m >= target:
        tile = target
    else:
        tile = max(8, _cdiv(m, 8) * 8)
    return tile, _cdiv(m, tile) * tile


def _pad_rows(a, axis, mult):
    n = a.shape[axis]
    n_pad = _cdiv(n, mult) * mult
    if n_pad == n:
        return a
    pad = [(0, 0)] * a.ndim
    pad[axis] = (0, n_pad - n)
    return jnp.pad(a, pad)


def _fold_bn(p):
    """Fold eval-mode BN into conv weight/bias. Returns (kh,kw,Cin,Cout), (Cout,)."""
    scale = p["gamma"] / jnp.sqrt(p["var"] + _BN_EPS)
    w_hwio = jnp.transpose(p["weight"], (2, 3, 1, 0)) * scale
    bias = p["beta"] - p["mean"] * scale
    return w_hwio, bias


# ----------------------------- Pallas kernels -------------------------------

def _stem_kernel(x_ref, w_ref, b_ref, o0_ref, o1_ref, o2_ref, *, c):
    # Fused 1x1 convs of branch0/1/2: one (tile, Cin) @ (Cin, 3*c256) matmul,
    # f32 bias + ReLU epilogue, written as three separate branch outputs.
    acc = jnp.dot(x_ref[...], w_ref[...], preferred_element_type=jnp.float32)
    y = jnp.maximum(acc + b_ref[...], 0.0)
    o0_ref[...] = y[:, :c].astype(o0_ref.dtype)
    o1_ref[...] = y[:, c:2 * c].astype(o1_ref.dtype)
    o2_ref[...] = y[:, 2 * c:].astype(o2_ref.dtype)


def _conv3x3_s1_kernel(pw_ref, w_ref, b_ref, o_ref, *, th, W):
    # 3x3 / stride 1 / pad 1 conv over a height block of th output rows.
    # pw_ref: (1, (th+2)*W, 3*Cin) width-im2col (incl. 2-row halo);
    # w_ref: (3, 3*Cin, Cout) -- one K=3*Cin weight slab per height tap.
    rows = th * W
    acc = jnp.dot(pw_ref[0, 0:rows, :], w_ref[0],
                  preferred_element_type=jnp.float32)
    acc = acc + jnp.dot(pw_ref[0, W:W + rows, :], w_ref[1],
                        preferred_element_type=jnp.float32)
    acc = acc + jnp.dot(pw_ref[0, 2 * W:2 * W + rows, :], w_ref[2],
                        preferred_element_type=jnp.float32)
    o_ref[0] = jnp.maximum(acc + b_ref[...], 0.0).astype(o_ref.dtype)


def _head_kernel(pe0_ref, po0_ref, pe1_ref, po1_ref, pe2_ref, po2_ref, px_ref,
                 w0_ref, w1_ref, w2_ref, b0_ref, b1_ref, b2_ref, o_ref,
                 *, n_rows, wo):
    # Fused final stage (per image): three 3x3/s2 convs, each as 3 height-tap
    # matmuls (K = 3*Cin, width taps folded into K) over even/odd-row
    # width-im2col slabs, per-branch f32 bias + ReLU, then ONE lane-dense
    # concatenated store together with the precomputed maxpool lanes.
    def conv_branch(pe_ref, po_ref, w_ref, b_ref):
        acc = jnp.dot(pe_ref[0, 0:n_rows, :], w_ref[0],          # kh = 0 (even)
                      preferred_element_type=jnp.float32)
        acc = acc + jnp.dot(po_ref[0, 0:n_rows, :], w_ref[1],    # kh = 1 (odd)
                            preferred_element_type=jnp.float32)
        acc = acc + jnp.dot(pe_ref[0, wo:wo + n_rows, :], w_ref[2],  # kh = 2
                            preferred_element_type=jnp.float32)
        return jnp.maximum(acc + b_ref[...], 0.0)

    y0 = conv_branch(pe0_ref, po0_ref, w0_ref, b0_ref)
    y1 = conv_branch(pe1_ref, po1_ref, w1_ref, b1_ref)
    y2 = conv_branch(pe2_ref, po2_ref, w2_ref, b2_ref)
    o_ref[0] = jnp.concatenate([y0, y1, y2, px_ref[0]], axis=-1)


# ----------------------------- pallas_call wrappers -------------------------

def _stem_call(x2d, w_cat, b_cat, c, out_dtype, *, tile_target=1024):
    M, cin = x2d.shape
    tile, m_pad = _tile_rows(M, tile_target)
    xp = _pad_rows(x2d, 0, tile)
    outs = pl.pallas_call(
        functools.partial(_stem_kernel, c=c),
        out_shape=[jax.ShapeDtypeStruct((m_pad, c), out_dtype),
                   jax.ShapeDtypeStruct((m_pad, c), out_dtype),
                   jax.ShapeDtypeStruct((m_pad, c), out_dtype)],
        grid=(m_pad // tile,),
        in_specs=[
            pl.BlockSpec((tile, cin), lambda i: (i, 0)),
            pl.BlockSpec((cin, 3 * c), lambda i: (0, 0)),
            pl.BlockSpec((1, 3 * c), lambda i: (0, 0)),
        ],
        out_specs=[pl.BlockSpec((tile, c), lambda i: (i, 0)),
                   pl.BlockSpec((tile, c), lambda i: (i, 0)),
                   pl.BlockSpec((tile, c), lambda i: (i, 0))],
        compiler_params=_COMPILER_PARAMS,
    )(xp, w_cat, b_cat.reshape(1, 3 * c))
    return tuple(o[:M] for o in outs)


def _conv3x3_s1_call(a_nhwc, w_taps, bias, out_dtype, *, th=8):
    # Grid over (N * height-blocks); each block carries a 2-row halo built in
    # the wrapper so the kernel only needs contiguous row-window slices.
    N, H, W, C = a_nhwc.shape
    cout = w_taps.shape[2]
    th = min(th, H)
    nhb = _cdiv(H, th)
    xp = jnp.pad(a_nhwc, ((0, 0), (1, 1), (1, 1), (0, 0)))        # (N,H+2,W+2,C)
    pw = jnp.concatenate([xp[:, :, kw:kw + W, :] for kw in range(3)],
                         axis=-1)                                  # (N,H+2,W,3C)
    pw = jnp.pad(pw, ((0, 0), (0, nhb * th + 2 - (H + 2)), (0, 0), (0, 0)))
    pwb = jnp.stack([pw[:, hb * th: hb * th + th + 2] for hb in range(nhb)],
                    axis=1)                                        # (N,nhb,th+2,W,3C)
    pwb = pwb.reshape(N * nhb, (th + 2) * W, 3 * C)
    out = pl.pallas_call(
        functools.partial(_conv3x3_s1_kernel, th=th, W=W),
        out_shape=jax.ShapeDtypeStruct((N * nhb, th * W, cout), out_dtype),
        grid=(N * nhb,),
        in_specs=[
            pl.BlockSpec((1, (th + 2) * W, 3 * C), lambda i: (i, 0, 0)),
            pl.BlockSpec((3, 3 * C, cout), lambda i: (0, 0, 0)),
            pl.BlockSpec((1, cout), lambda i: (0, 0)),
        ],
        out_specs=pl.BlockSpec((1, th * W, cout), lambda i: (i, 0, 0)),
        compiler_params=_COMPILER_PARAMS,
    )(pwb, w_taps, bias.reshape(1, cout))
    return out.reshape(N, nhb * th, W, cout)[:, :H]


def _s2_wim2col(a_nhwc):
    """Stride-2 width-im2col, split into even/odd input rows.

    Returns (pe, po) flattened to (N, rows*Wo, 3C); for output row ho the
    three height taps are pe[ho], po[ho], pe[ho+1] (contiguous slices).
    """
    N, H, W, C = a_nhwc.shape
    Wo = (W - 3) // 2 + 1
    cols = [jax.lax.slice(a_nhwc, (0, 0, kw, 0),
                          (N, H, kw + 2 * (Wo - 1) + 1, C), (1, 1, 2, 1))
            for kw in range(3)]
    pw = jnp.concatenate(cols, axis=-1)          # (N, H, Wo, 3C)
    pe = pw[:, 0::2]
    po = pw[:, 1::2]
    pe = pe.reshape(N, pe.shape[1] * Wo, 3 * C)
    po = po.reshape(N, po.shape[1] * Wo, 3 * C)
    return pe, po


def _head_call(pe0, po0, pe1, po1, pe2, po2, px,
               w0, w1, w2, b0, b1, b2, *, ho, wo):
    N = pe0.shape[0]
    n_rows = ho * wo
    ctot = w0.shape[2] + w1.shape[2] + w2.shape[2] + px.shape[2]

    def blk3(a):
        return pl.BlockSpec((1,) + a.shape[1:], lambda i: (i, 0, 0))

    def cst3(a):
        return pl.BlockSpec(a.shape, lambda i: (0, 0, 0))

    def cst2(a):
        return pl.BlockSpec(a.shape, lambda i: (0, 0))

    return pl.pallas_call(
        functools.partial(_head_kernel, n_rows=n_rows, wo=wo),
        out_shape=jax.ShapeDtypeStruct((N, n_rows, ctot), jnp.float32),
        grid=(N,),
        in_specs=[blk3(pe0), blk3(po0), blk3(pe1), blk3(po1),
                  blk3(pe2), blk3(po2), blk3(px),
                  cst3(w0), cst3(w1), cst3(w2),
                  cst2(b0), cst2(b1), cst2(b2)],
        out_specs=pl.BlockSpec((1, n_rows, ctot), lambda i: (i, 0, 0)),
        compiler_params=_COMPILER_PARAMS,
    )(pe0, po0, pe1, po1, pe2, po2, px, w0, w1, w2, b0, b1, b2)


# ----------------------------- JAX glue -------------------------------------

def mixed_7a_forward(params, x_nchw, compute_dtype=jnp.float32):
    x = jnp.transpose(x_nchw, (0, 2, 3, 1))          # NCHW -> NHWC
    N, H, W, cin = x.shape
    ho = (H - 3) // 2 + 1
    wo = (W - 3) // 2 + 1

    # ---- fused 1x1 stems (branch0/1/2 share the same input) ----
    w00, b00 = _fold_bn(params["b0_0"])
    w10, b10 = _fold_bn(params["b1_0"])
    w20, b20 = _fold_bn(params["b2_0"])
    c256 = w00.shape[-1]
    w_stem = jnp.concatenate(
        [w00.reshape(cin, c256), w10.reshape(cin, c256),
         w20.reshape(cin, c256)], axis=1).astype(compute_dtype)
    b_stem = jnp.concatenate([b00, b10, b20], axis=0)
    b0, b1, b2a = _stem_call(x.reshape(N * H * W, cin).astype(compute_dtype),
                             w_stem, b_stem, c256, compute_dtype)
    b0 = b0.reshape(N, H, W, c256)
    b1 = b1.reshape(N, H, W, c256)
    b2a = b2a.reshape(N, H, W, c256)

    # ---- branch2 middle conv: 3x3 / s1 / p1 ----
    w21, b21 = _fold_bn(params["b2_1"])
    c288 = w21.shape[-1]
    b2b = _conv3x3_s1_call(
        b2a, w21.reshape(3, 3 * c256, c288).astype(compute_dtype),
        b21, compute_dtype)

    # ---- branch3: 3x3/s2 maxpool, computed once outside the head kernel ----
    # (per perf review: feeding a 1x pooled tensor instead of 9x tap-stacking
    # the widest input removes the head's largest DMA stream)
    pooled = jax.lax.reduce_window(x, -jnp.inf, jax.lax.max,
                                   (1, 3, 3, 1), (1, 2, 2, 1), "VALID")
    pooled = pooled.reshape(N, ho * wo, cin).astype(jnp.float32)

    # ---- fused head: three 3x3/s2 convs + pool pass-through + concat ----
    w01, b01 = _fold_bn(params["b0_1"])
    w11, b11 = _fold_bn(params["b1_1"])
    w22, b22 = _fold_bn(params["b2_2"])
    c384 = w01.shape[-1]
    c288b = w11.shape[-1]
    c320 = w22.shape[-1]

    pe0, po0 = _s2_wim2col(b0)
    pe1, po1 = _s2_wim2col(b1)
    pe2, po2 = _s2_wim2col(b2b)

    out2d = _head_call(
        pe0, po0, pe1, po1, pe2, po2, pooled,
        w01.reshape(3, 3 * c256, c384).astype(compute_dtype),
        w11.reshape(3, 3 * c256, c288b).astype(compute_dtype),
        w22.reshape(3, 3 * c288, c320).astype(compute_dtype),
        b01.reshape(1, c384), b11.reshape(1, c288b), b22.reshape(1, c320),
        ho=ho, wo=wo)
    out = out2d.reshape(N, ho, wo, -1)
    return jnp.transpose(out, (0, 3, 1, 2))          # NHWC -> NCHW


# ----------------------------- Params ----------------------------------------

def init_basic_conv(key, cin, cout, ksize):
    kw_, kg, kb, km, kv = jax.random.split(key, 5)
    return dict(
        weight=jax.random.normal(kw_, (cout, cin, ksize, ksize), jnp.float32) * 0.1,
        gamma=0.5 + jax.random.uniform(kg, (cout,), jnp.float32),
        beta=jax.random.normal(kb, (cout,), jnp.float32) * 0.1,
        mean=jax.random.normal(km, (cout,), jnp.float32) * 0.1,
        var=0.5 + jax.random.uniform(kv, (cout,), jnp.float32),
    )


def init_mixed_7a(key, in_features, width):
    c256 = mult_filters(256, width)
    c384 = mult_filters(384, width)
    c288 = mult_filters(288, width)
    c320 = mult_filters(320, width)
    keys = jax.random.split(key, 7)
    params = {
        "b0_0": init_basic_conv(keys[0], in_features, c256, 1),
        "b0_1": init_basic_conv(keys[1], c256, c384, 3),
        "b1_0": init_basic_conv(keys[2], in_features, c256, 1),
        "b1_1": init_basic_conv(keys[3], c256, c288, 3),
        "b2_0": init_basic_conv(keys[4], in_features, c256, 1),
        "b2_1": init_basic_conv(keys[5], c256, c288, 3),
        "b2_2": init_basic_conv(keys[6], c288, c320, 3),
    }
    out_features = c384 + c288 + c320 + in_features
    return params, out_features


# ----------------------------- Reference (pure JAX) --------------------------

def _ref_basic_conv(p, x_nhwc, ksize, stride, padding):
    w_hwio = jnp.transpose(p["weight"], (2, 3, 1, 0))
    y = jax.lax.conv_general_dilated(
        x_nhwc, w_hwio, (stride, stride),
        [(padding, padding), (padding, padding)],
        dimension_numbers=("NHWC", "HWIO", "NHWC"))
    y = (y - p["mean"]) / jnp.sqrt(p["var"] + _BN_EPS) * p["gamma"] + p["beta"]
    return jnp.maximum(y, 0.0)


def _ref_forward(params, x_nchw):
    x = jnp.transpose(x_nchw, (0, 2, 3, 1))
    b0 = _ref_basic_conv(params["b0_1"],
                         _ref_basic_conv(params["b0_0"], x, 1, 1, 0), 3, 2, 0)
    b1 = _ref_basic_conv(params["b1_1"],
                         _ref_basic_conv(params["b1_0"], x, 1, 1, 0), 3, 2, 0)
    b2 = _ref_basic_conv(params["b2_0"], x, 1, 1, 0)
    b2 = _ref_basic_conv(params["b2_1"], b2, 3, 1, 1)
    b2 = _ref_basic_conv(params["b2_2"], b2, 3, 2, 0)
    b3 = jax.lax.reduce_window(x, -jnp.inf, jax.lax.max,
                               (1, 3, 3, 1), (1, 2, 2, 1), "VALID")
    out = jnp.concatenate([b0, b1, b2, b3], axis=-1)
    return jnp.transpose(out, (0, 3, 1, 2))


# ----------------------------- Main -------------------------------------------

if __name__ == "__main__":
    key = jax.random.PRNGKey(0)
    kx, kp = jax.random.split(key)

    # Small config: width=1/32 -> channels (c256,c384,c288,c320) = (8,12,9,10)
    N, in_features, H, W = 2, 8, 9, 9
    width = 1.0 / 32.0

    x = jax.random.normal(kx, (N, in_features, H, W), jnp.float32)
    params, out_features = init_mixed_7a(kp, in_features, width)

    ref = jax.block_until_ready(_ref_forward(params, x))

    # f32 operand path: tight numerical check against the XLA reference.
    fwd_f32 = jax.jit(functools.partial(mixed_7a_forward,
                                        compute_dtype=jnp.float32))
    out_f32 = jax.block_until_ready(fwd_f32(params, x))
    assert out_f32.shape == (N, out_features, 4, 4), out_f32.shape
    np.testing.assert_allclose(np.asarray(out_f32), np.asarray(ref),
                               rtol=1e-3, atol=1e-3)

    # bf16 matmul-operand path (f32 accumulate / epilogue), per perf review;
    # looser tolerance because weights/activations are rounded to bf16.
    fwd_bf16 = jax.jit(functools.partial(mixed_7a_forward,
                                         compute_dtype=jnp.bfloat16))
    out_bf16 = jax.block_until_ready(fwd_bf16(params, x))
    assert out_bf16.shape == (N, out_features, 4, 4), out_bf16.shape
    np.testing.assert_allclose(np.asarray(out_bf16), np.asarray(ref),
                               rtol=5e-2, atol=5e-2)

    print("KERNEL_OK")
</pallas_src>

<mosaic_0001>
module attributes {stable_mosaic.version = 11 : i64} {
  func.func @_stem_kernel(%arg0: i32, %arg1: memref<168x8xf32, #tpu.memory_space<vmem>>, %arg2: memref<8x24xf32, #tpu.memory_space<vmem>>, %arg3: memref<1x24xf32, #tpu.memory_space<vmem>>, %arg4: memref<168x8xf32, #tpu.memory_space<vmem>>, %arg5: memref<168x8xf32, #tpu.memory_space<vmem>>, %arg6: memref<168x8xf32, #tpu.memory_space<vmem>>) attributes {dimension_semantics = [#tpu.dimension_semantics<parallel>], iteration_bounds = array<i64: 1>, scalar_prefetch = 0 : i64, scratch_operands = 0 : i64, tpu.core_type = #tpu.core_type<tc>, window_params = [{transform_indices = @transform_0, window_bounds = array<i64: 168, 8>}, {pipeline_mode = #tpu.pipeline_mode<synchronous>, transform_indices = @transform_1, window_bounds = array<i64: 8, 24>}, {pipeline_mode = #tpu.pipeline_mode<synchronous>, transform_indices = @transform_2, window_bounds = array<i64: 1, 24>}, {transform_indices = @transform_3, window_bounds = array<i64: 168, 8>}, {transform_indices = @transform_4, window_bounds = array<i64: 168, 8>}, {transform_indices = @transform_5, window_bounds = array<i64: 168, 8>}]} {
    %c0 = arith.constant 0 : index
    %c0_0 = arith.constant 0 : index
    %0 = vector.load %arg1[%c0, %c0_0] : memref<168x8xf32, #tpu.memory_space<vmem>>, vector<168x8xf32>
    %c0_1 = arith.constant 0 : index
    %c0_2 = arith.constant 0 : index
    %1 = vector.load %arg2[%c0_1, %c0_2] : memref<8x24xf32, #tpu.memory_space<vmem>>, vector<8x24xf32>
    %cst = arith.constant dense<0.000000e+00> : vector<168x24xf32>
    %2 = tpu.matmul %0, %1, %cst {dimension_numbers = #tpu.dot_dimension_numbers<[1], [0], [0], [1], [0, 0, 1, 1], [], []>} : vector<168x8xf32>, vector<8x24xf32>, vector<168x24xf32> -> vector<168x24xf32>
    %c0_3 = arith.constant 0 : index
    %c0_4 = arith.constant 0 : index
    %3 = vector.load %arg3[%c0_3, %c0_4] : memref<1x24xf32, #tpu.memory_space<vmem>>, vector<1x24xf32>
    %4 = vector.broadcast %3 : vector<1x24xf32> to vector<168x24xf32>
    %5 = arith.addf %2, %4 : vector<168x24xf32>
    %cst_5 = arith.constant 0.000000e+00 : f32
    %6 = vector.broadcast %cst_5 : f32 to vector<168x24xf32>
    %7 = arith.maximumf %5, %6 : vector<168x24xf32>
    %8 = vector.extract_strided_slice %7 {offsets = [0, 0], sizes = [168, 8], strides = [1, 1]} : vector<168x24xf32> to vector<168x8xf32>
    %c0_6 = arith.constant 0 : index
    %c0_7 = arith.constant 0 : index
    %9 = vector.load %arg4[%c0_6, %c0_7] : memref<168x8xf32, #tpu.memory_space<vmem>>, vector<168x8xf32>
    tpu.vector_store %arg4[%c0_6, %c0_7], %8 {strides = array<i32>} : memref<168x8xf32, #tpu.memory_space<vmem>>, vector<168x8xf32>,
    %10 = vector.extract_strided_slice %7 {offsets = [0, 8], sizes = [168, 8], strides = [1, 1]} : vector<168x24xf32> to vector<168x8xf32>
    %c0_8 = arith.constant 0 : index
    %c0_9 = arith.constant 0 : index
    %11 = vector.load %arg5[%c0_8, %c0_9] : memref<168x8xf32, #tpu.memory_space<vmem>>, vector<168x8xf32>
    tpu.vector_store %arg5[%c0_8, %c0_9], %10 {strides = array<i32>} : memref<168x8xf32, #tpu.memory_space<vmem>>, vector<168x8xf32>,
    %12 = vector.extract_strided_slice %7 {offsets = [0, 16], sizes = [168, 8], strides = [1, 1]} : vector<168x24xf32> to vector<168x8xf32>
    %c0_10 = arith.constant 0 : index
    %c0_11 = arith.constant 0 : index
    %13 = vector.load %arg6[%c0_10, %c0_11] : memref<168x8xf32, #tpu.memory_space<vmem>>, vector<168x8xf32>
    tpu.vector_store %arg6[%c0_10, %c0_11], %12 {strides = array<i32>} : memref<168x8xf32, #tpu.memory_space<vmem>>, vector<168x8xf32>,
    return
  }
  func.func @transform_0(%arg0: i32) -> (i32, i32) {
    %c0_i32 = arith.constant 0 : i32
    %c0_i32_0 = arith.constant 0 : i32
    return %arg0, %c0_i32 : i32, i32
  }
  func.func @transform_1(%arg0: i32) -> (i32, i32) {
    %c0_i32 = arith.constant 0 : i32
    %c0_i32_0 = arith.constant 0 : i32
    %c0_i32_1 = arith.constant 0 : i32
    return %c0_i32, %c0_i32_0 : i32, i32
  }
  func.func @transform_2(%arg0: i32) -> (i32, i32) {
    %c0_i32 = arith.constant 0 : i32
    %c0_i32_0 = arith.constant 0 : i32
    %c0_i32_1 = arith.constant 0 : i32
    return %c0_i32, %c0_i32_0 : i32, i32
  }
  func.func @transform_3(%arg0: i32) -> (i32, i32) {
    %c0_i32 = arith.constant 0 : i32
    %c0_i32_0 = arith.constant 0 : i32
    return %arg0, %c0_i32 : i32, i32
  }
  func.func @transform_4(%arg0: i32) -> (i32, i32) {
    %c0_i32 = arith.constant 0 : i32
    %c0_i32_0 = arith.constant 0 : i32
    return %arg0, %c0_i32 : i32, i32
  }
  func.func @transform_5(%arg0: i32) -> (i32, i32) {
    %c0_i32 = arith.constant 0 : i32
    %c0_i32_0 = arith.constant 0 : i32
    return %arg0, %c0_i32 : i32, i32
  }
}

module attributes {stable_mosaic.version = 11 : i64} {
  func.func @_conv3x3_s1_kernel(%arg0: i32, %arg1: memref<1x90x24xf32, #tpu.memory_space<vmem>>, %arg2: memref<3x24x9xf32, #tpu.memory_space<vmem>>, %arg3: memref<1x9xf32, #tpu.memory_space<vmem>>, %arg4: memref<1x72x9xf32, #tpu.memory_space<vmem>>) attributes {dimension_semantics = [#tpu.dimension_semantics<parallel>], iteration_bounds = array<i64: 4>, scalar_prefetch = 0 : i64, scratch_operands = 0 : i64, tpu.core_type = #tpu.core_type<tc>, window_params = [{transform_indices = @transform_0, window_bounds = array<i64: 1, 90, 24>}, {pipeline_mode = #tpu.pipeline_mode<synchronous>, transform_indices = @transform_1, window_bounds = array<i64: 3, 24, 9>}, {pipeline_mode = #tpu.pipeline_mode<synchronous>, transform_indices = @transform_2, window_bounds = array<i64: 1, 9>}, {transform_indices = @transform_3, window_bounds = array<i64: 1, 72, 9>}]} {
    %c0 = arith.constant 0 : index
    %c0_0 = arith.constant 0 : index
    %c0_1 = arith.constant 0 : index
    %0 = vector.load %arg1[%c0, %c0_0, %c0_1] : memref<1x90x24xf32, #tpu.memory_space<vmem>>, vector<1x72x24xf32>
    %1 = vector.shape_cast %0 : vector<1x72x24xf32> to vector<72x24xf32>
    %c0_2 = arith.constant 0 : index
    %c0_3 = arith.constant 0 : index
    %c0_4 = arith.constant 0 : index
    %2 = vector.load %arg2[%c0_2, %c0_3, %c0_4] : memref<3x24x9xf32, #tpu.memory_space<vmem>>, vector<1x24x9xf32>
    %3 = vector.shape_cast %2 : vector<1x24x9xf32> to vector<24x9xf32>
    %cst = arith.constant dense<0.000000e+00> : vector<72x9xf32>
    %4 = tpu.matmul %1, %3, %cst {dimension_numbers = #tpu.dot_dimension_numbers<[1], [0], [0], [1], [0, 0, 1, 1], [], []>} : vector<72x24xf32>, vector<24x9xf32>, vector<72x9xf32> -> vector<72x9xf32>
    %c0_5 = arith.constant 0 : index
    %c9 = arith.constant 9 : index
    %c0_6 = arith.constant 0 : index
    %5 = vector.load %arg1[%c0_5, %c9, %c0_6] : memref<1x90x24xf32, #tpu.memory_space<vmem>>, vector<1x72x24xf32>
    %6 = vector.shape_cast %5 : vector<1x72x24xf32> to vector<72x24xf32>
    %c1 = arith.constant 1 : index
    %c0_7 = arith.constant 0 : index
    %c0_8 = arith.constant 0 : index
    %7 = vector.load %arg2[%c1, %c0_7, %c0_8] : memref<3x24x9xf32, #tpu.memory_space<vmem>>, vector<1x24x9xf32>
    %8 = vector.shape_cast %7 : vector<1x24x9xf32> to vector<24x9xf32>
    %cst_9 = arith.constant dense<0.000000e+00> : vector<72x9xf32>
    %9 = tpu.matmul %6, %8, %cst_9 {dimension_numbers = #tpu.dot_dimension_numbers<[1], [0], [0], [1], [0, 0, 1, 1], [], []>} : vector<72x24xf32>, vector<24x9xf32>, vector<72x9xf32> -> vector<72x9xf32>
    %10 = arith.addf %4, %9 : vector<72x9xf32>
    %c0_10 = arith.constant 0 : index
    %c18 = arith.constant 18 : index
    %c0_11 = arith.constant 0 : index
    %11 = vector.load %arg1[%c0_10, %c18, %c0_11] : memref<1x90x24xf32, #tpu.memory_space<vmem>>, vector<1x72x24xf32>
    %12 = vector.shape_cast %11 : vector<1x72x24xf32> to vector<72x24xf32>
    %c2 = arith.constant 2 : index
    %c0_12 = arith.constant 0 : index
    %c0_13 = arith.constant 0 : index
    %13 = vector.load %arg2[%c2, %c0_12, %c0_13] : memref<3x24x9xf32, #tpu.memory_space<vmem>>, vector<1x24x9xf32>
    %14 = vector.shape_cast %13 : vector<1x24x9xf32> to vector<24x9xf32>
    %cst_14 = arith.constant dense<0.000000e+00> : vector<72x9xf32>
    %15 = tpu.matmul %12, %14, %cst_14 {dimension_numbers = #tpu.dot_dimension_numbers<[1], [0], [0], [1], [0, 0, 1, 1], [], []>} : vector<72x24xf32>, vector<24x9xf32>, vector<72x9xf32> -> vector<72x9xf32>
    %16 = arith.addf %10, %15 : vector<72x9xf32>
    %c0_15 = arith.constant 0 : index
    %c0_16 = arith.constant 0 : index
    %17 = vector.load %arg3[%c0_15, %c0_16] : memref<1x9xf32, #tpu.memory_space<vmem>>, vector<1x9xf32>
    %18 = vector.broadcast %17 : vector<1x9xf32> to vector<72x9xf32>
    %19 = arith.addf %16, %18 : vector<72x9xf32>
    %cst_17 = arith.constant 0.000000e+00 : f32
    %20 = vector.broadcast %cst_17 : f32 to vector<72x9xf32>
    %21 = arith.maximumf %19, %20 : vector<72x9xf32>
    %c0_18 = arith.constant 0 : index
    %c0_19 = arith.constant 0 : index
    %c0_20 = arith.constant 0 : index
    %22 = vector.load %arg4[%c0_18, %c0_19, %c0_20] : memref<1x72x9xf32, #tpu.memory_space<vmem>>, vector<1x72x9xf32>
    %23 = vector.shape_cast %22 : vector<1x72x9xf32> to vector<72x9xf32>
    %24 = vector.shape_cast %21 : vector<72x9xf32> to vector<1x72x9xf32>
    tpu.vector_store %arg4[%c0_18, %c0_19, %c0_20], %24 {strides = array<i32>} : memref<1x72x9xf32, #tpu.memory_space<vmem>>, vector<1x72x9xf32>,
    return
  }
  func.func @transform_0(%arg0: i32) -> (i32, i32, i32) {
    %c0_i32 = arith.constant 0 : i32
    %c0_i32_0 = arith.constant 0 : i32
    %c0_i32_1 = arith.constant 0 : i32
    return %arg0, %c0_i32, %c0_i32_0 : i32, i32, i32
  }
  func.func @transform_1(%arg0: i32) -> (i32, i32, i32) {
    %c0_i32 = arith.constant 0 : i32
    %c0_i32_0 = arith.constant 0 : i32
    %c0_i32_1 = arith.constant 0 : i32
    %c0_i32_2 = arith.constant 0 : i32
    return %c0_i32, %c0_i32_0, %c0_i32_1 : i32, i32, i32
  }
  func.func @transform_2(%arg0: i32) -> (i32, i32) {
    %c0_i32 = arith.constant 0 : i32
    %c0_i32_0 = arith.constant 0 : i32
    %c0_i32_1 = arith.constant 0 : i32
    return %c0_i32, %c0_i32_0 : i32, i32
  }
  func.func @transform_3(%arg0: i32) -> (i32, i32, i32) {
    %c0_i32 = arith.constant 0 : i32
    %c0_i32_0 = arith.constant 0 : i32
    %c0_i32_1 = arith.constant 0 : i32
    return %arg0, %c0_i32, %c0_i32_0 : i32, i32, i32
  }
}

module attributes {stable_mosaic.version = 11 : i64} {
  func.func @_head_kernel(%arg0: i32, %arg1: memref<1x20x24xf32, #tpu.memory_space<vmem>>, %arg2: memref<1x16x24xf32, #tpu.memory_space<vmem>>, %arg3: memref<1x20x24xf32, #tpu.memory_space<vmem>>, %arg4: memref<1x16x24xf32, #tpu.memory_space<vmem>>, %arg5: memref<1x20x27xf32, #tpu.memory_space<vmem>>, %arg6: memref<1x16x27xf32, #tpu.memory_space<vmem>>, %arg7: memref<1x16x8xf32, #tpu.memory_space<vmem>>, %arg8: memref<3x24x12xf32, #tpu.memory_space<vmem>>, %arg9: memref<3x24x9xf32, #tpu.memory_space<vmem>>, %arg10: memref<3x27x10xf32, #tpu.memory_space<vmem>>, %arg11: memref<1x12xf32, #tpu.memory_space<vmem>>, %arg12: memref<1x9xf32, #tpu.memory_space<vmem>>, %arg13: memref<1x10xf32, #tpu.memory_space<vmem>>, %arg14: memref<1x16x39xf32, #tpu.memory_space<vmem>>) attributes {dimension_semantics = [#tpu.dimension_semantics<parallel>], iteration_bounds = array<i64: 2>, scalar_prefetch = 0 : i64, scratch_operands = 0 : i64, tpu.core_type = #tpu.core_type<tc>, window_params = [{transform_indices = @transform_0, window_bounds = array<i64: 1, 20, 24>}, {transform_indices = @transform_1, window_bounds = array<i64: 1, 16, 24>}, {transform_indices = @transform_2, window_bounds = array<i64: 1, 20, 24>}, {transform_indices = @transform_3, window_bounds = array<i64: 1, 16, 24>}, {transform_indices = @transform_4, window_bounds = array<i64: 1, 20, 27>}, {transform_indices = @transform_5, window_bounds = array<i64: 1, 16, 27>}, {transform_indices = @transform_6, window_bounds = array<i64: 1, 16, 8>}, {pipeline_mode = #tpu.pipeline_mode<synchronous>, transform_indices = @transform_7, window_bounds = array<i64: 3, 24, 12>}, {pipeline_mode = #tpu.pipeline_mode<synchronous>, transform_indices = @transform_8, window_bounds = array<i64: 3, 24, 9>}, {pipeline_mode = #tpu.pipeline_mode<synchronous>, transform_indices = @transform_9, window_bounds = array<i64: 3, 27, 10>}, {pipeline_mode = #tpu.pipeline_mode<synchronous>, transform_indices = @transform_10, window_bounds = array<i64: 1, 12>}, {pipeline_mode = #tpu.pipeline_mode<synchronous>, transform_indices = @transform_11, window_bounds = array<i64: 1, 9>}, {pipeline_mode = #tpu.pipeline_mode<synchronous>, transform_indices = @transform_12, window_bounds = array<i64: 1, 10>}, {transform_indices = @transform_13, window_bounds = array<i64: 1, 16, 39>}]} {
    %c0 = arith.constant 0 : index
    %c0_0 = arith.constant 0 : index
    %c0_1 = arith.constant 0 : index
    %0 = vector.load %arg1[%c0, %c0_0, %c0_1] : memref<1x20x24xf32, #tpu.memory_space<vmem>>, vector<1x16x24xf32>
    %1 = vector.shape_cast %0 : vector<1x16x24xf32> to vector<16x24xf32>
    %c0_2 = arith.constant 0 : index
    %c0_3 = arith.constant 0 : index
    %c0_4 = arith.constant 0 : index
    %2 = vector.load %arg8[%c0_2, %c0_3, %c0_4] : memref<3x24x12xf32, #tpu.memory_space<vmem>>, vector<1x24x12xf32>
    %3 = vector.shape_cast %2 : vector<1x24x12xf32> to vector<24x12xf32>
    %cst = arith.constant dense<0.000000e+00> : vector<16x12xf32>
    %4 = tpu.matmul %1, %3, %cst {dimension_numbers = #tpu.dot_dimension_numbers<[1], [0], [0], [1], [0, 0, 1, 1], [], []>} : vector<16x24xf32>, vector<24x12xf32>, vector<16x12xf32> -> vector<16x12xf32>
    %c0_5 = arith.constant 0 : index
    %c0_6 = arith.constant 0 : index
    %c0_7 = arith.constant 0 : index
    %5 = vector.load %arg2[%c0_5, %c0_6, %c0_7] : memref<1x16x24xf32, #tpu.memory_space<vmem>>, vector<1x16x24xf32>
    %6 = vector.shape_cast %5 : vector<1x16x24xf32> to vector<16x24xf32>
    %c1 = arith.constant 1 : index
    %c0_8 = arith.constant 0 : index
    %c0_9 = arith.constant 0 : index
    %7 = vector.load %arg8[%c1, %c0_8, %c0_9] : memref<3x24x12xf32, #tpu.memory_space<vmem>>, vector<1x24x12xf32>
    %8 = vector.shape_cast %7 : vector<1x24x12xf32> to vector<24x12xf32>
    %cst_10 = arith.constant dense<0.000000e+00> : vector<16x12xf32>
    %9 = tpu.matmul %6, %8, %cst_10 {dimension_numbers = #tpu.dot_dimension_numbers<[1], [0], [0], [1], [0, 0, 1, 1], [], []>} : vector<16x24xf32>, vector<24x12xf32>, vector<16x12xf32> -> vector<16x12xf32>
    %10 = arith.addf %4, %9 : vector<16x12xf32>
    %c0_11 = arith.constant 0 : index
    %c4 = arith.constant 4 : index
    %c0_12 = arith.constant 0 : index
    %11 = vector.load %arg1[%c0_11, %c4, %c0_12] : memref<1x20x24xf32, #tpu.memory_space<vmem>>, vector<1x16x24xf32>
    %12 = vector.shape_cast %11 : vector<1x16x24xf32> to vector<16x24xf32>
    %c2 = arith.constant 2 : index
    %c0_13 = arith.constant 0 : index
    %c0_14 = arith.constant 0 : index
    %13 = vector.load %arg8[%c2, %c0_13, %c0_14] : memref<3x24x12xf32, #tpu.memory_space<vmem>>, vector<1x24x12xf32>
    %14 = vector.shape_cast %13 : vector<1x24x12xf32> to vector<24x12xf32>
    %cst_15 = arith.constant dense<0.000000e+00> : vector<16x12xf32>
    %15 = tpu.matmul %12, %14, %cst_15 {dimension_numbers = #tpu.dot_dimension_numbers<[1], [0], [0], [1], [0, 0, 1, 1], [], []>} : vector<16x24xf32>, vector<24x12xf32>, vector<16x12xf32> -> vector<16x12xf32>
    %16 = arith.addf %10, %15 : vector<16x12xf32>
    %c0_16 = arith.constant 0 : index
    %c0_17 = arith.constant 0 : index
    %17 = vector.load %arg11[%c0_16, %c0_17] : memref<1x12xf32, #tpu.memory_space<vmem>>, vector<1x12xf32>
    %18 = vector.broadcast %17 : vector<1x12xf32> to vector<16x12xf32>
    %19 = arith.addf %16, %18 : vector<16x12xf32>
    %cst_18 = arith.constant 0.000000e+00 : f32
    %20 = vector.broadcast %cst_18 : f32 to vector<16x12xf32>
    %21 = arith.maximumf %19, %20 : vector<16x12xf32>
    %c0_19 = arith.constant 0 : index
    %c0_20 = arith.constant 0 : index
    %c0_21 = arith.constant 0 : index
    %22 = vector.load %arg3[%c0_19, %c0_20, %c0_21] : memref<1x20x24xf32, #tpu.memory_space<vmem>>, vector<1x16x24xf32>
    %23 = vector.shape_cast %22 : vector<1x16x24xf32> to vector<16x24xf32>
    %c0_22 = arith.constant 0 : index
    %c0_23 = arith.constant 0 : index
    %c0_24 = arith.constant 0 : index
    %24 = vector.load %arg9[%c0_22, %c0_23, %c0_24] : memref<3x24x9xf32, #tpu.memory_space<vmem>>, vector<1x24x9xf32>
    %25 = vector.shape_cast %24 : vector<1x24x9xf32> to vector<24x9xf32>
    %cst_25 = arith.constant dense<0.000000e+00> : vector<16x9xf32>
    %26 = tpu.matmul %23, %25, %cst_25 {dimension_numbers = #tpu.dot_dimension_numbers<[1], [0], [0], [1], [0, 0, 1, 1], [], []>} : vector<16x24xf32>, vector<24x9xf32>, vector<16x9xf32> -> vector<16x9xf32>
    %c0_26 = arith.constant 0 : index
    %c0_27 = arith.constant 0 : index
    %c0_28 = arith.constant 0 : index
    %27 = vector.load %arg4[%c0_26, %c0_27, %c0_28] : memref<1x16x24xf32, #tpu.memory_space<vmem>>, vector<1x16x24xf32>
    %28 = vector.shape_cast %27 : vector<1x16x24xf32> to vector<16x24xf32>
    %c1_29 = arith.constant 1 : index
    %c0_30 = arith.constant 0 : index
    %c0_31 = arith.constant 0 : index
    %29 = vector.load %arg9[%c1_29, %c0_30, %c0_31] : memref<3x24x9xf32, #tpu.memory_space<vmem>>, vector<1x24x9xf32>
    %30 = vector.shape_cast %29 : vector<1x24x9xf32> to vector<24x9xf32>
    %cst_32 = arith.constant dense<0.000000e+00> : vector<16x9xf32>
    %31 = tpu.matmul %28, %30, %cst_32 {dimension_numbers = #tpu.dot_dimension_numbers<[1], [0], [0], [1], [0, 0, 1, 1], [], []>} : vector<16x24xf32>, vector<24x9xf32>, vector<16x9xf32> -> vector<16x9xf32>
    %32 = arith.addf %26, %31 : vector<16x9xf32>
    %c0_33 = arith.constant 0 : index
    %c4_34 = arith.constant 4 : index
    %c0_35 = arith.constant 0 : index
    %33 = vector.load %arg3[%c0_33, %c4_34, %c0_35] : memref<1x20x24xf32, #tpu.memory_space<vmem>>, vector<1x16x24xf32>
    %34 = vector.shape_cast %33 : vector<1x16x24xf32> to vector<16x24xf32>
    %c2_36 = arith.constant 2 : index
    %c0_37 = arith.constant 0 : index
    %c0_38 = arith.constant 0 : index
    %35 = vector.load %arg9[%c2_36, %c0_37, %c0_38] : memref<3x24x9xf32, #tpu.memory_space<vmem>>, vector<1x24x9xf32>
    %36 = vector.shape_cast %35 : vector<1x24x9xf32> to vector<24x9xf32>
    %cst_39 = arith.constant dense<0.000000e+00> : vector<16x9xf32>
    %37 = tpu.matmul %34, %36, %cst_39 {dimension_numbers = #tpu.dot_dimension_numbers<[1], [0], [0], [1], [0, 0, 1, 1], [], []>} : vector<16x24xf32>, vector<24x9xf32>, vector<16x9xf32> -> vector<16x9xf32>
    %38 = arith.addf %32, %37 : vector<16x9xf32>
    %c0_40 = arith.constant 0 : index
    %c0_41 = arith.constant 0 : index
    %39 = vector.load %arg12[%c0_40, %c0_41] : memref<1x9xf32, #tpu.memory_space<vmem>>, vector<1x9xf32>
    %40 = vector.broadcast %39 : vector<1x9xf32> to vector<16x9xf32>
    %41 = arith.addf %38, %40 : vector<16x9xf32>
    %cst_42 = arith.constant 0.000000e+00 : f32
    %42 = vector.broadcast %cst_42 : f32 to vector<16x9xf32>
    %43 = arith.maximumf %41, %42 : vector<16x9xf32>
    %c0_43 = arith.constant 0 : index
    %c0_44 = arith.constant 0 : index
    %c0_45 = arith.constant 0 : index
    %44 = vector.load %arg5[%c0_43, %c0_44, %c0_45] : memref<1x20x27xf32, #tpu.memory_space<vmem>>, vector<1x16x27xf32>
    %45 = vector.shape_cast %44 : vector<1x16x27xf32> to vector<16x27xf32>
    %c0_46 = arith.constant 0 : index
    %c0_47 = arith.constant 0 : index
    %c0_48 = arith.constant 0 : index
    %46 = vector.load %arg10[%c0_46, %c0_47, %c0_48] : memref<3x27x10xf32, #tpu.memory_space<vmem>>, vector<1x27x10xf32>
    %47 = vector.shape_cast %46 : vector<1x27x10xf32> to vector<27x10xf32>
    %cst_49 = arith.constant dense<0.000000e+00> : vector<16x10xf32>
    %48 = tpu.matmul %45, %47, %cst_49 {dimension_numbers = #tpu.dot_dimension_numbers<[1], [0], [0], [1], [0, 0, 1, 1], [], []>} : vector<16x27xf32>, vector<27x10xf32>, vector<16x10xf32> -> vector<16x10xf32>
    %c0_50 = arith.constant 0 : index
    %c0_51 = arith.constant 0 : index
    %c0_52 = arith.constant 0 : index
    %49 = vector.load %arg6[%c0_50, %c0_51, %c0_52] : memref<1x16x27xf32, #tpu.memory_space<vmem>>, vector<1x16x27xf32>
    %50 = vector.shape_cast %49 : vector<1x16x27xf32> to vector<16x27xf32>
    %c1_53 = arith.constant 1 : index
    %c0_54 = arith.constant 0 : index
    %c0_55 = arith.constant 0 : index
    %51 = vector.load %arg10[%c1_53, %c0_54, %c0_55] : memref<3x27x10xf32, #tpu.memory_space<vmem>>, vector<1x27x10xf32>
    %52 = vector.shape_cast %51 : vector<1x27x10xf32> to vector<27x10xf32>
    %cst_56 = arith.constant dense<0.000000e+00> : vector<16x10xf32>
    %53 = tpu.matmul %50, %52, %cst_56 {dimension_numbers = #tpu.dot_dimension_numbers<[1], [0], [0], [1], [0, 0, 1, 1], [], []>} : vector<16x27xf32>, vector<27x10xf32>, vector<16x10xf32> -> vector<16x10xf32>
    %54 = arith.addf %48, %53 : vector<16x10xf32>
    %c0_57 = arith.constant 0 : index
    %c4_58 = arith.constant 4 : index
    %c0_59 = arith.constant 0 : index
    %55 = vector.load %arg5[%c0_57, %c4_58, %c0_59] : memref<1x20x27xf32, #tpu.memory_space<vmem>>, vector<1x16x27xf32>
    %56 = vector.shape_cast %55 : vector<1x16x27xf32> to vector<16x27xf32>
    %c2_60 = arith.constant 2 : index
    %c0_61 = arith.constant 0 : index
    %c0_62 = arith.constant 0 : index
    %57 = vector.load %arg10[%c2_60, %c0_61, %c0_62] : memref<3x27x10xf32, #tpu.memory_space<vmem>>, vector<1x27x10xf32>
    %58 = vector.shape_cast %57 : vector<1x27x10xf32> to vector<27x10xf32>
    %cst_63 = arith.constant dense<0.000000e+00> : vector<16x10xf32>
    %59 = tpu.matmul %56, %58, %cst_63 {dimension_numbers = #tpu.dot_dimension_numbers<[1], [0], [0], [1], [0, 0, 1, 1], [], []>} : vector<16x27xf32>, vector<27x10xf32>, vector<16x10xf32> -> vector<16x10xf32>
    %60 = arith.addf %54, %59 : vector<16x10xf32>
    %c0_64 = arith.constant 0 : index
    %c0_65 = arith.constant 0 : index
    %61 = vector.load %arg13[%c0_64, %c0_65] : memref<1x10xf32, #tpu.memory_space<vmem>>, vector<1x10xf32>
    %62 = vector.broadcast %61 : vector<1x10xf32> to vector<16x10xf32>
    %63 = arith.addf %60, %62 : vector<16x10xf32>
    %cst_66 = arith.constant 0.000000e+00 : f32
    %64 = vector.broadcast %cst_66 : f32 to vector<16x10xf32>
    %65 = arith.maximumf %63, %64 : vector<16x10xf32>
    %c0_67 = arith.constant 0 : index
    %c0_68 = arith.constant 0 : index
    %c0_69 = arith.constant 0 : index
    %66 = vector.load %arg7[%c0_67, %c0_68, %c0_69] : memref<1x16x8xf32, #tpu.memory_space<vmem>>, vector<1x16x8xf32>
    %67 = vector.shape_cast %66 : vector<1x16x8xf32> to vector<16x8xf32>
    %68 = tpu.concatenate %21, %43, %65, %67 in 1 : vector<16x12xf32>, vector<16x9xf32>, vector<16x10xf32>, vector<16x8xf32> -> vector<16x39xf32>
    %c0_70 = arith.constant 0 : index
    %c0_71 = arith.constant 0 : index
    %c0_72 = arith.constant 0 : index
    %69 = vector.load %arg14[%c0_70, %c0_71, %c0_72] : memref<1x16x39xf32, #tpu.memory_space<vmem>>, vector<1x16x39xf32>
    %70 = vector.shape_cast %69 : vector<1x16x39xf32> to vector<16x39xf32>
    %71 = vector.shape_cast %68 : vector<16x39xf32> to vector<1x16x39xf32>
    tpu.vector_store %arg14[%c0_70, %c0_71, %c0_72], %71 {strides = array<i32>} : memref<1x16x39xf32, #tpu.memory_space<vmem>>, vector<1x16x39xf32>,
    return
  }
  func.func @transform_0(%arg0: i32) -> (i32, i32, i32) {
    %c0_i32 = arith.constant 0 : i32
    %c0_i32_0 = arith.constant 0 : i32
    %c0_i32_1 = arith.constant 0 : i32
    return %arg0, %c0_i32, %c0_i32_0 : i32, i32, i32
  }
  func.func @transform_1(%arg0: i32) -> (i32, i32, i32) {
    %c0_i32 = arith.constant 0 : i32
    %c0_i32_0 = arith.constant 0 : i32
    %c0_i32_1 = arith.constant 0 : i32
    return %arg0, %c0_i32, %c0_i32_0 : i32, i32, i32
  }
  func.func @transform_2(%arg0: i32) -> (i32, i32, i32) {
    %c0_i32 = arith.constant 0 : i32
    %c0_i32_0 = arith.constant 0 : i32
    %c0_i32_1 = arith.constant 0 : i32
    return %arg0, %c0_i32, %c0_i32_0 : i32, i32, i32
  }
  func.func @transform_3(%arg0: i32) -> (i32, i32, i32) {
    %c0_i32 = arith.constant 0 : i32
    %c0_i32_0 = arith.constant 0 : i32
    %c0_i32_1 = arith.constant 0 : i32
    return %arg0, %c0_i32, %c0_i32_0 : i32, i32, i32
  }
  func.func @transform_4(%arg0: i32) -> (i32, i32, i32) {
    %c0_i32 = arith.constant 0 : i32
    %c0_i32_0 = arith.constant 0 : i32
    %c0_i32_1 = arith.constant 0 : i32
    return %arg0, %c0_i32, %c0_i32_0 : i32, i32, i32
  }
  func.func @transform_5(%arg0: i32) -> (i32, i32, i32) {
    %c0_i32 = arith.constant 0 : i32
    %c0_i32_0 = arith.constant 0 : i32
    %c0_i32_1 = arith.constant 0 : i32
    return %arg0, %c0_i32, %c0_i32_0 : i32, i32, i32
  }
  func.func @transform_6(%arg0: i32) -> (i32, i32, i32) {
    %c0_i32 = arith.constant 0 : i32
    %c0_i32_0 = arith.constant 0 : i32
    %c0_i32_1 = arith.constant 0 : i32
    return %arg0, %c0_i32, %c0_i32_0 : i32, i32, i32
  }
  func.func @transform_7(%arg0: i32) -> (i32, i32, i32) {
    %c0_i32 = arith.constant 0 : i32
    %c0_i32_0 = arith.constant 0 : i32
    %c0_i32_1 = arith.constant 0 : i32
    %c0_i32_2 = arith.constant 0 : i32
    return %c0_i32, %c0_i32_0, %c0_i32_1 : i32, i32, i32
  }
  func.func @transform_8(%arg0: i32) -> (i32, i32, i32) {
    %c0_i32 = arith.constant 0 : i32
    %c0_i32_0 = arith.constant 0 : i32
    %c0_i32_1 = arith.constant 0 : i32
    %c0_i32_2 = arith.constant 0 : i32
    return %c0_i32, %c0_i32_0, %c0_i32_1 : i32, i32, i32
  }
  func.func @transform_9(%arg0: i32) -> (i32, i32, i32) {
    %c0_i32 = arith.constant 0 : i32
    %c0_i32_0 = arith.constant 0 : i32
    %c0_i32_1 = arith.constant 0 : i32
    %c0_i32_2 = arith.constant 0 : i32
    return %c0_i32, %c0_i32_0, %c0_i32_1 : i32, i32, i32
  }
  func.func @transform_10(%arg0: i32) -> (i32, i32) {
    %c0_i32 = arith.constant 0 : i32
    %c0_i32_0 = arith.constant 0 : i32
    %c0_i32_1 = arith.constant 0 : i32
    return %c0_i32, %c0_i32_0 : i32, i32
  }
  func.func @transform_11(%arg0: i32) -> (i32, i32) {
    %c0_i32 = arith.constant 0 : i32
    %c0_i32_0 = arith.constant 0 : i32
    %c0_i32_1 = arith.constant 0 : i32
    return %c0_i32, %c0_i32_0 : i32, i32
  }
  func.func @transform_12(%arg0: i32) -> (i32, i32) {
    %c0_i32 = arith.constant 0 : i32
    %c0_i32_0 = arith.constant 0 : i32
    %c0_i32_1 = arith.constant 0 : i32
    return %c0_i32, %c0_i32_0 : i32, i32
  }
  func.func @transform_13(%arg0: i32) -> (i32, i32, i32) {
    %c0_i32 = arith.constant 0 : i32
    %c0_i32_0 = arith.constant 0 : i32
    %c0_i32_1 = arith.constant 0 : i32
    return %arg0, %c0_i32, %c0_i32_0 : i32, i32, i32
  }
}

</mosaic_0001>

<bundles_post_ra>
// kernel: mixed_7a_forward.3
= control target key start
LH: loop header
LB: loop body
LE: loop exit
PB: predicated region body
PF: predicated region fallthrough
CT: control target
= control target key end

     0   :  { %vm43_vm0 = vcmask 64512   ;;  %s457_s13 = smov 120   ;;  %s458_s25 = smov 112   ;;  %s921_s1 = inlined_call_operand.vmem [shape: f32[8,24], index: 1, kind: input, shape index: {}]   ;;  %s922_s0 = inlined_call_operand.vmem [shape: f32[168,8], index: 0, kind: input, shape index: {}]   ;;  %s923_s2 = inlined_call_operand.vmem [shape: f32[1,24], index: 2, kind: input, shape index: {}]   ;;  %s924_s3 = inlined_call_operand.vmem [shape: f32[168,8], index: 3, kind: output, shape index: {0}]   ;;  %s925_s4 = inlined_call_operand.vmem [shape: f32[168,8], index: 4, kind: output, shape index: {1}]   ;;  %s926_s5 = inlined_call_operand.vmem [shape: f32[168,8], index: 5, kind: output, shape index: {2}]  }
   0x1   :  { %v38_v0 = vld [vmem:[%s921_s1] sm:$0xff]  ;;  %v23_v2 = vld [vmem:[%s922_s0 + $0x30] sm:$0xff]  ;;  %v24_v5 = vld [vmem:[%s922_s0 + $0x38] sm:$0xff] }
   0x2   :  { %v17_v1 = vld [vmem:[%s922_s0] sm:$0xff]  ;;  %122 = vmatpush.msra.mxu0 %v38_v0  ;;  %451 = vmatpush.msra.mxu1 %v38_v0  ;;  %v35_v4 = vld [vmem:[%s922_s0 + $0x90] sm:$0xff]  ;;  %v18_v6 = vld [vmem:[%s922_s0 + $0x8] sm:$0xff] }
   0x3   :  { %430 = vmatmul.msk.f32.vlgmr.msra.gmra.mxu0 %vm43_vm0, %v17_v1  ;;  %436 = vmatmul.msk.f32.vlgmr.msra.gmra.mxu1 %vm43_vm0, %v23_v2  ;;  %v29_v3 = vld [vmem:[%s922_s0 + $0x60] sm:$0xff]  ;;  %v30_v7 = vld [vmem:[%s922_s0 + $0x68] sm:$0xff]  ;;  %v36_v8 = vld [vmem:[%s922_s0 + $0x98] sm:$0xff] }
   0x4   :  { %452 = vmatpush.msra.mxu2 %v38_v0  ;;  %453 = vmatpush.msra.mxu3 %v38_v0  ;;  %v25_v9 = vld [vmem:[%s922_s0 + $0x40] sm:$0xff]  ;;  %v19_v10 = vld [vmem:[%s922_s0 + $0x10] sm:$0xff]  ;;  %v20_v13 = vld [vmem:[%s922_s0 + $0x18] sm:$0xff] }
   0x5   :  { %442 = vmatmul.msk.f32.vlgmr.msra.gmra.mxu2 %vm43_vm0, %v29_v3  ;;  %448 = vmatmul.msk.f32.vlgmr.msra.gmra.mxu3 %vm43_vm0, %v35_v4  ;;  %v31_v11 = vld [vmem:[%s922_s0 + $0x70] sm:$0xff]  ;;  %v37_v12 = vld [vmem:[%s922_s0 + $0xa0] sm:$0xff]  ;;  %v26_v14 = vld [vmem:[%s922_s0 + $0x48] sm:$0xff] }
   0x6   :  { %v32_v15 = vld [vmem:[%s922_s0 + $0x78] sm:$0xff]  ;;  %v21_v16 = vld [vmem:[%s922_s0 + $0x20] sm:$0xff]  ;;  %v27_v17 = vld [vmem:[%s922_s0 + $0x50] sm:$0xff] }
   0x7   :  { %v33_v18 = vld [vmem:[%s922_s0 + $0x80] sm:$0xff]  ;;  %v22_v19 = vld [vmem:[%s922_s0 + $0x28] sm:$0xff]  ;;  %v28_v20 = vld [vmem:[%s922_s0 + $0x58] sm:$0xff] }
   0x8   :  { %v34_v21 = vld [vmem:[%s922_s0 + $0x88] sm:$0xff]  ;;  %v579_v22 = vld [vmem:[%s923_s2] ss:$0 sm:$0xff] }
   0xb   :  { %437 = vmatmul.msk.f32.gmra.mxu1 %vm43_vm0, %v24_v5  ;;  %431 = vmatmul.msk.f32.gmra.mxu0 %vm43_vm0, %v18_v6 }
   0xd   :  { %443 = vmatmul.msk.f32.gmra.mxu2 %vm43_vm0, %v30_v7  ;;  %449 = vmatmul.msk.f32.gmra.mxu3 %vm43_vm0, %v36_v8 }
  0x13   :  { %438 = vmatmul.msk.f32.gmra.mxu1 %vm43_vm0, %v25_v9  ;;  %432 = vmatmul.msk.f32.gmra.mxu0 %vm43_vm0, %v19_v10 }
  0x15   :  { %444 = vmatmul.msk.f32.gmra.mxu2 %vm43_vm0, %v31_v11  ;;  %450 = vmatmul.msk.f32.gmra.mxu3 %vm43_vm0, %v37_v12 }
  0x1b   :  { %433 = vmatmul.msk.f32.gmra.mxu0 %vm43_vm0, %v20_v13  ;;  %439 = vmatmul.msk.f32.gmra.mxu1 %vm43_vm0, %v26_v14 }
  0x1d   :  { %445 = vmatmul.msk.f32.gmra.mxu2 %vm43_vm0, %v32_v15 }
  0x23   :  { %434 = vmatmul.msk.f32.gmra.mxu0 %vm43_vm0, %v21_v16  ;;  %440 = vmatmul.msk.f32.gmra.mxu1 %vm43_vm0, %v27_v17 }
  0x25   :  { %446 = vmatmul.msk.f32.gmra.mxu2 %vm43_vm0, %v33_v18 }
  0x2b   :  { %435 = vmatmul.msk.f32.gmra.mxu0 %vm43_vm0, %v22_v19  ;;  %441 = vmatmul.msk.f32.gmra.mxu1 %vm43_vm0, %v28_v20 }
  0x2d   :  { %447 = vmatmul.msk.f32.gmra.mxu2 %vm43_vm0, %v34_v21 }
  0x80   :  { %v124_v23 = vpop.f32.mrf.mxu0  ;;  %v142_v24 = vpop.f32.mrf.mxu1 }
  0x81   :  { %v125_v25 = vadd.f32 %v579_v22, %v124_v23  ;;  %v143_v26 = vadd.f32 %v579_v22, %v142_v24 }
  0x83   :  { %v187_v27 = vmax.f32 %v125_v25, 0.0  ;;  %v193_v28 = vmax.f32 %v143_v26, 0.0 }
  0x85   :  { %208 = vst.msk [vmem:[%s924_s3] sm:$0xff] %vm43_vm0, %v187_v27  ;;  %250 = vrot.lane.b32.xlu0 %v187_v27, %s457_s13 }
  0x86   :  { %214 = vst.msk [vmem:[%s924_s3 + $0x30] sm:$0xff] %vm43_vm0, %v193_v28 }
  0x88   :  { %v145_v29 = vpop.f32.mrf.mxu1  ;;  %v127_v30 = vpop.f32.mrf.mxu0 }
  0x89   :  { %v146_v31 = vadd.f32 %v579_v22, %v145_v29  ;;  %v128_v32 = vadd.f32 %v579_v22, %v127_v30  ;;  %v160_v33 = vpop.f32.mrf.mxu2  ;;  %v178_v34 = vpop.f32.mrf.mxu3 }
  0x8a   :  { %v161_v35 = vadd.f32 %v579_v22, %v160_v33  ;;  %v179_v36 = vadd.f32 %v579_v22, %v178_v34 }
  0x8b   :  { %v194_v37 = vmax.f32 %v146_v31, 0.0  ;;  %v596_v38 = vmax.f32 %v128_v32, 0.0 }
  0x8c   :  { %v598_v39 = vmax.f32 %v161_v35, 0.0  ;;  %v600_v40 = vmax.f32 %v179_v36, 0.0 }
  0x8d   :  { %215 = vst.msk [vmem:[%s924_s3 + $0x38] sm:$0xff] %vm43_vm0, %v194_v37  ;;  %264 = vrot.lane.b32.xlu1 %v194_v37, %s457_s13  ;;  %262 = vrot.lane.b32.xlu0 %v193_v28, %s457_s13 }
  0x8e   :  { %209 = vst.msk [vmem:[%s924_s3 + $0x8] sm:$0xff] %vm43_vm0, %v596_v38 }
  0x8f   :  { %220 = vst.msk [vmem:[%s924_s3 + $0x60] sm:$0xff] %vm43_vm0, %v598_v39 }
  0x90   :  { %v148_v41 = vpop.f32.mrf.mxu1  ;;  %v130_v42 = vpop.f32.mrf.mxu0  ;;  %226 = vst.msk [vmem:[%s924_s3 + $0x90] sm:$0xff] %vm43_vm0, %v600_v40 }
  0x91   :  { %v149_v43 = vadd.f32 %v579_v22, %v148_v41  ;;  %v131_v44 = vadd.f32 %v579_v22, %v130_v42  ;;  %v163_v45 = vpop.f32.mrf.mxu2  ;;  %v181_v46 = vpop.f32.mrf.mxu3 }
  0x92   :  { %v164_v47 = vadd.f32 %v579_v22, %v163_v45  ;;  %v182_v48 = vadd.f32 %v579_v22, %v181_v46 }
  0x93   :  { %v195_v49 = vmax.f32 %v149_v43, 0.0  ;;  %v189_v50 = vmax.f32 %v131_v44, 0.0 }
  0x94   :  { %v200_v51 = vmax.f32 %v164_v47, 0.0  ;;  %v627_v52 = vmax.f32 %v182_v48, 0.0 }
  0x95   :  { %216 = vst.msk [vmem:[%s924_s3 + $0x40] sm:$0xff] %vm43_vm0, %v195_v49  ;;  %266 = vrot.lane.b32.xlu2 %v195_v49, %s457_s13  ;;  %336 = vrot.lane.b32.xlu1 %v596_v38, %s458_s25 }
  0x96   :  { %334 = vrot.lane.b32.xlu0 %v187_v27, %s458_s25  ;;  %210 = vst.msk [vmem:[%s924_s3 + $0x10] sm:$0xff] %vm43_vm0, %v189_v50 }
  0x97   :  { %221 = vst.msk [vmem:[%s924_s3 + $0x68] sm:$0xff] %vm43_vm0, %v200_v51 }
  0x98   :  { %227 = vst.msk [vmem:[%s924_s3 + $0x98] sm:$0xff] %vm43_vm0, %v627_v52  ;;  %v133_v53 = vpop.f32.mrf.mxu0  ;;  %v151_v62 = vpop.f32.mrf.mxu1 }
  0x99   :  { %v166_v54 = vpop.f32.mrf.mxu2  ;;  %v184_v55 = vpop.f32.mrf.mxu3  ;;  %v134_v56 = vadd.f32 %v579_v22, %v133_v53  ;;  %v152_v63 = vadd.f32 %v579_v22, %v151_v62 }
  0x9a   :  { %v167_v57 = vadd.f32 %v579_v22, %v166_v54  ;;  %v185_v58 = vadd.f32 %v579_v22, %v184_v55 }
  0x9b   :  { %v190_v59 = vmax.f32 %v134_v56, 0.0  ;;  %v196_v2 = vmax.f32 %v152_v63, 0.0 }
  0x9c   :  { %v201_v60 = vmax.f32 %v167_v57, 0.0  ;;  %v655_v61 = vmax.f32 %v185_v58, 0.0 }
  0x9d   :  { %338 = vrot.lane.b32.xlu2 %v189_v50, %s458_s25  ;;  %348 = vrot.lane.b32.xlu1 %v194_v37, %s458_s25  ;;  %211 = vst.msk [vmem:[%s924_s3 + $0x18] sm:$0xff] %vm43_vm0, %v190_v59 }
  0x9e   :  { %346 = vrot.lane.b32.xlu0 %v193_v28, %s458_s25  ;;  %222 = vst.msk [vmem:[%s924_s3 + $0x70] sm:$0xff] %vm43_vm0, %v201_v60 }
  0x9f   :  { %228 = vst.msk [vmem:[%s924_s3 + $0xa0] sm:$0xff] %vm43_vm0, %v655_v61 }
  0xa0   :  { %v136_v0 = vpop.f32.mrf.mxu0  ;;  %217 = vst.msk [vmem:[%s924_s3 + $0x48] sm:$0xff] %vm43_vm0, %v196_v2  ;;  %v154_v4 = vpop.f32.mrf.mxu1 }
  0xa1   :  { %v137_v1 = vadd.f32 %v579_v22, %v136_v0  ;;  %v155_v5 = vadd.f32 %v579_v22, %v154_v4  ;;  %v169_v13 = vpop.f32.mrf.mxu2 }
  0xa2   :  { %v170_v14 = vadd.f32 %v579_v22, %v169_v13 }
  0xa3   :  { %v191_v3 = vmax.f32 %v137_v1, 0.0  ;;  %v197_v8 = vmax.f32 %v155_v5, 0.0 }
  0xa4   :  { %v202_v15 = vmax.f32 %v170_v14, 0.0 }
  0xa5   :  { %350 = vrot.lane.b32.xlu2 %v195_v49, %s458_s25  ;;  %276 = vrot.lane.b32.xlu1 %v200_v51, %s457_s13  ;;  %212 = vst.msk [vmem:[%s924_s3 + $0x20] sm:$0xff] %vm43_vm0, %v191_v3 }
  0xa6   :  { %274 = vrot.lane.b32.xlu0 %v598_v39, %s457_s13  ;;  %218 = vst.msk [vmem:[%s924_s3 + $0x50] sm:$0xff] %vm43_vm0, %v197_v8 }
  0xa7   :  { %223 = vst.msk [vmem:[%s924_s3 + $0x78] sm:$0xff] %vm43_vm0, %v202_v15 }
  0xa8   :  { %v139_v6 = vpop.f32.mrf.mxu0  ;;  %v157_v10 = vpop.f32.mrf.mxu1 }
  0xa9   :  { %v140_v7 = vadd.f32 %v579_v22, %v139_v6  ;;  %v158_v11 = vadd.f32 %v579_v22, %v157_v10  ;;  %v172_v16 = vpop.f32.mrf.mxu2 }
  0xaa   :  { %v173_v17 = vadd.f32 %v579_v22, %v172_v16 }
  0xab   :  { %v192_v9 = vmax.f32 %v140_v7, 0.0  ;;  %v198_v12 = vmax.f32 %v158_v11, 0.0 }
  0xac   :  { %v203_v18 = vmax.f32 %v173_v17, 0.0 }
  0xad   :  { %278 = vrot.lane.b32.xlu2 %v201_v60, %s457_s13  ;;  %288 = vrot.lane.b32.xlu1 %v627_v52, %s457_s13  ;;  %213 = vst.msk [vmem:[%s924_s3 + $0x28] sm:$0xff] %vm43_vm0, %v192_v9 }
  0xae   :  { %286 = vrot.lane.b32.xlu0 %v600_v40, %s457_s13  ;;  %219 = vst.msk [vmem:[%s924_s3 + $0x58] sm:$0xff] %vm43_vm0, %v198_v12 }
  0xaf   :  { %224 = vst.msk [vmem:[%s924_s3 + $0x80] sm:$0xff] %vm43_vm0, %v203_v18 }
  0xb1   :  { %v175_v19 = vpop.f32.mrf.mxu2 }
  0xb2   :  { %v176_v20 = vadd.f32 %v579_v22, %v175_v19 }
  0xb4   :  { %v204_v21 = vmax.f32 %v176_v20, 0.0 }
  0xb5   :  { %290 = vrot.lane.b32.xlu2 %v655_v61, %s457_s13  ;;  %360 = vrot.lane.b32.xlu1 %v200_v51, %s458_s25 }
  0xb6   :  { %358 = vrot.lane.b32.xlu0 %v598_v39, %s458_s25  ;;  %225 = vst.msk [vmem:[%s924_s3 + $0x88] sm:$0xff] %vm43_vm0, %v204_v21 }
  0xbd   :  { %362 = vrot.lane.b32.xlu2 %v201_v60, %s458_s25  ;;  %254 = vrot.lane.b32.xlu1 %v189_v50, %s457_s13 }
  0xbe   :  { %252 = vrot.lane.b32.xlu0 %v596_v38, %s457_s13 }
  0xc5   :  { %258 = vrot.lane.b32.xlu2 %v191_v3, %s457_s13  ;;  %256 = vrot.lane.b32.xlu1 %v190_v59, %s457_s13 }
  0xc6   :  { %268 = vrot.lane.b32.xlu0 %v196_v2, %s457_s13 }
  0xcd   :  { %260 = vrot.lane.b32.xlu2 %v192_v9, %s457_s13  ;;  %270 = vrot.lane.b32.xlu1 %v197_v8, %s457_s13 }
  0xce   :  { %340 = vrot.lane.b32.xlu0 %v190_v59, %s458_s25 }
  0xd5   :  { %272 = vrot.lane.b32.xlu2 %v198_v12, %s457_s13  ;;  %342 = vrot.lane.b32.xlu1 %v191_v3, %s458_s25 }
  0xd6   :  { %352 = vrot.lane.b32.xlu0 %v196_v2, %s458_s25 }
  0xdd   :  { %344 = vrot.lane.b32.xlu2 %v192_v9, %s458_s25  ;;  %354 = vrot.lane.b32.xlu1 %v197_v8, %s458_s25 }
  0xde   :  { %280 = vrot.lane.b32.xlu0 %v202_v15, %s457_s13 }
  0xe5   :  { %356 = vrot.lane.b32.xlu2 %v198_v12, %s458_s25  ;;  %282 = vrot.lane.b32.xlu1 %v203_v18, %s457_s13 }
  0xe6   :  { %364 = vrot.lane.b32.xlu0 %v202_v15, %s458_s25 }
  0xed   :  { %284 = vrot.lane.b32.xlu2 %v204_v21, %s457_s13  ;;  %366 = vrot.lane.b32.xlu1 %v203_v18, %s458_s25 }
  0xee   :  { %370 = vrot.lane.b32.xlu0 %v600_v40, %s458_s25 }
  0xef   :  { %v267_v22 = vpop.permute.xlu2 %266 }
  0xf0   :  { %321 = vst.msk [vmem:[%s925_s4 + $0x40] sm:$0xff] %vm43_vm0, %v267_v22 }
  0xf5   :  { %368 = vrot.lane.b32.xlu2 %v204_v21, %s458_s25  ;;  %372 = vrot.lane.b32.xlu1 %v627_v52, %s458_s25 }
  0xf7   :  { %v339_v23 = vpop.permute.xlu2 %338  ;;  %v251_v24 = vpop.permute.xlu0 %250 }
  0xf8   :  { %399 = vst.msk [vmem:[%s926_s5 + $0x10] sm:$0xff] %vm43_vm0, %v339_v23 }
  0xf9   :  { %313 = vst.msk [vmem:[%s925_s4] sm:$0xff] %vm43_vm0, %v251_v24 }
  0xfd   :  { %374 = vrot.lane.b32.xlu2 %v655_v61, %s458_s25 }
  0xff   :  { %v265_v25 = vpop.permute.xlu1 %264  ;;  %v351_v26 = vpop.permute.xlu2 %350 }
 0x100   :  { %320 = vst.msk [vmem:[%s925_s4 + $0x38] sm:$0xff] %vm43_vm0, %v265_v25  ;;  %v263_v27 = vpop.permute.xlu0 %262 }
 0x101   :  { %405 = vst.msk [vmem:[%s926_s5 + $0x40] sm:$0xff] %vm43_vm0, %v351_v26 }
 0x102   :  { %319 = vst.msk [vmem:[%s925_s4 + $0x30] sm:$0xff] %vm43_vm0, %v263_v27 }
 0x107   :  { %v279_v28 = vpop.permute.xlu2 %278  ;;  %v337_v29 = vpop.permute.xlu1 %336 }
 0x108   :  { %327 = vst.msk [vmem:[%s925_s4 + $0x70] sm:$0xff] %vm43_vm0, %v279_v28  ;;  %v335_v30 = vpop.permute.xlu0 %334 }
 0x109   :  { %398 = vst.msk [vmem:[%s926_s5 + $0x8] sm:$0xff] %vm43_vm0, %v337_v29 }
 0x10a   :  { %397 = vst.msk [vmem:[%s926_s5] sm:$0xff] %vm43_vm0, %v335_v30 }
 0x10f   :  { %v291_v31 = vpop.permute.xlu2 %290  ;;  %v349_v32 = vpop.permute.xlu1 %348 }
 0x110   :  { %333 = vst.msk [vmem:[%s925_s4 + $0xa0] sm:$0xff] %vm43_vm0, %v291_v31  ;;  %v347_v33 = vpop.permute.xlu0 %346 }
 0x111   :  { %404 = vst.msk [vmem:[%s926_s5 + $0x38] sm:$0xff] %vm43_vm0, %v349_v32 }
 0x112   :  { %403 = vst.msk [vmem:[%s926_s5 + $0x30] sm:$0xff] %vm43_vm0, %v347_v33 }
 0x117   :  { %v363_v34 = vpop.permute.xlu2 %362  ;;  %v277_v35 = vpop.permute.xlu1 %276 }
 0x118   :  { %411 = vst.msk [vmem:[%s926_s5 + $0x70] sm:$0xff] %vm43_vm0, %v363_v34  ;;  %v275_v36 = vpop.permute.xlu0 %274 }
 0x119   :  { %326 = vst.msk [vmem:[%s925_s4 + $0x68] sm:$0xff] %vm43_vm0, %v277_v35 }
 0x11a   :  { %325 = vst.msk [vmem:[%s925_s4 + $0x60] sm:$0xff] %vm43_vm0, %v275_v36 }
 0x11f   :  { %v259_v37 = vpop.permute.xlu2 %258  ;;  %v289_v38 = vpop.permute.xlu1 %288 }
 0x120   :  { %317 = vst.msk [vmem:[%s925_s4 + $0x20] sm:$0xff] %vm43_vm0, %v259_v37  ;;  %v287_v39 = vpop.permute.xlu0 %286 }
 0x121   :  { %332 = vst.msk [vmem:[%s925_s4 + $0x98] sm:$0xff] %vm43_vm0, %v289_v38 }
 0x122   :  { %331 = vst.msk [vmem:[%s925_s4 + $0x90] sm:$0xff] %vm43_vm0, %v287_v39 }
 0x127   :  { %v261_v40 = vpop.permute.xlu2 %260  ;;  %v361_v41 = vpop.permute.xlu1 %360 }
 0x128   :  { %318 = vst.msk [vmem:[%s925_s4 + $0x28] sm:$0xff] %vm43_vm0, %v261_v40  ;;  %v359_v42 = vpop.permute.xlu0 %358 }
 0x129   :  { %410 = vst.msk [vmem:[%s926_s5 + $0x68] sm:$0xff] %vm43_vm0, %v361_v41 }
 0x12a   :  { %409 = vst.msk [vmem:[%s926_s5 + $0x60] sm:$0xff] %vm43_vm0, %v359_v42 }
 0x12f   :  { %v273_v43 = vpop.permute.xlu2 %272  ;;  %v255_v44 = vpop.permute.xlu1 %254 }
 0x130   :  { %324 = vst.msk [vmem:[%s925_s4 + $0x58] sm:$0xff] %vm43_vm0, %v273_v43  ;;  %v253_v45 = vpop.permute.xlu0 %252 }
 0x131   :  { %315 = vst.msk [vmem:[%s925_s4 + $0x10] sm:$0xff] %vm43_vm0, %v255_v44 }
 0x132   :  { %314 = vst.msk [vmem:[%s925_s4 + $0x8] sm:$0xff] %vm43_vm0, %v253_v45 }
 0x137   :  { %v345_v46 = vpop.permute.xlu2 %344  ;;  %v257_v47 = vpop.permute.xlu1 %256 }
 0x138   :  { %402 = vst.msk [vmem:[%s926_s5 + $0x28] sm:$0xff] %vm43_vm0, %v345_v46  ;;  %v269_v48 = vpop.permute.xlu0 %268 }
 0x139   :  { %316 = vst.msk [vmem:[%s925_s4 + $0x18] sm:$0xff] %vm43_vm0, %v257_v47 }
 0x13a   :  { %322 = vst.msk [vmem:[%s925_s4 + $0x48] sm:$0xff] %vm43_vm0, %v269_v48 }
 0x13f   :  { %v357_v49 = vpop.permute.xlu2 %356  ;;  %v271_v50 = vpop.permute.xlu1 %270 }
 0x140   :  { %408 = vst.msk [vmem:[%s926_s5 + $0x58] sm:$0xff] %vm43_vm0, %v357_v49  ;;  %v341_v51 = vpop.permute.xlu0 %340 }
 0x141   :  { %323 = vst.msk [vmem:[%s925_s4 + $0x50] sm:$0xff] %vm43_vm0, %v271_v50 }
 0x142   :  { %400 = vst.msk [vmem:[%s926_s5 + $0x18] sm:$0xff] %vm43_vm0, %v341_v51 }
 0x147   :  { %v285_v52 = vpop.permute.xlu2 %284  ;;  %v343_v53 = vpop.permute.xlu1 %342 }
 0x148   :  { %330 = vst.msk [vmem:[%s925_s4 + $0x88] sm:$0xff] %vm43_vm0, %v285_v52  ;;  %v353_v54 = vpop.permute.xlu0 %352 }
 0x149   :  { %401 = vst.msk [vmem:[%s926_s5 + $0x20] sm:$0xff] %vm43_vm0, %v343_v53 }
 0x14a   :  { %406 = vst.msk [vmem:[%s926_s5 + $0x48] sm:$0xff] %vm43_vm0, %v353_v54 }
 0x14f   :  { %v369_v55 = vpop.permute.xlu2 %368  ;;  %v355_v56 = vpop.permute.xlu1 %354 }
 0x150   :  { %414 = vst.msk [vmem:[%s926_s5 + $0x88] sm:$0xff] %vm43_vm0, %v369_v55  ;;  %v281_v57 = vpop.permute.xlu0 %280 }
 0x151   :  { %407 = vst.msk [vmem:[%s926_s5 + $0x50] sm:$0xff] %vm43_vm0, %v355_v56 }
 0x152   :  { %328 = vst.msk [vmem:[%s925_s4 + $0x78] sm:$0xff] %vm43_vm0, %v281_v57 }
 0x157   :  { %v375_v58 = vpop.permute.xlu2 %374  ;;  %v283_v59 = vpop.permute.xlu1 %282 }
 0x158   :  { %417 = vst.msk [vmem:[%s926_s5 + $0xa0] sm:$0xff] %vm43_vm0, %v375_v58  ;;  %v365_v60 = vpop.permute.xlu0 %364 }
 0x159   :  { %329 = vst.msk [vmem:[%s925_s4 + $0x80] sm:$0xff] %vm43_vm0, %v283_v59 }
 0x15a   :  { %412 = vst.msk [vmem:[%s926_s5 + $0x78] sm:$0xff] %vm43_vm0, %v365_v60 }
 0x15f   :  { %v367_v61 = vpop.permute.xlu1 %366 }
 0x160   :  { %413 = vst.msk [vmem:[%s926_s5 + $0x80] sm:$0xff] %vm43_vm0, %v367_v61  ;;  %v371_v62 = vpop.permute.xlu0 %370 }
 0x161   :  { %415 = vst.msk [vmem:[%s926_s5 + $0x90] sm:$0xff] %vm43_vm0, %v371_v62 }
 0x167   :  { %v373_v63 = vpop.permute.xlu1 %372 }
 0x168   :  { %416 = vst.msk [vmem:[%s926_s5 + $0x98] sm:$0xff] %vm43_vm0, %v373_v63 }

// kernel: mixed_7a_forward.4
= control target key start
LH: loop header
LB: loop body
LE: loop exit
PB: predicated region body
PF: predicated region fallthrough
CT: control target
= control target key end

     0   :  { %s609_s12 = smov 0   ;;  %s747_s0 = inlined_call_operand.vmem [shape: f32[4,90,24], index: 0, kind: input, shape index: {}]   ;;  %s748_s1 = inlined_call_operand.vmem [shape: f32[3,24,9], index: 1, kind: input, shape index: {}]   ;;  %s749_s2 = inlined_call_operand.vmem [shape: f32[1,9], index: 2, kind: input, shape index: {}]   ;;  %s750_s3 = inlined_call_operand.vmem [shape: f32[4,72,9], index: 3, kind: output, shape index: {}]  }
   0x1 LB: > { %s519_s13 = sadd.s32 4294967295, %s587_s12   ;;  %p523_p0 = scmp.ge.s32.totalorder %s587_s12, 1  ;;  %s587_s12 = sphi %s609_s12, %s13_s12  }
   0x2   : > { %p137_p1 = scmp.lt.s32.totalorder %s587_s12, 5 }
   0x4   : > { %p138_p2 = pnand %p523_p0, %p137_p1 }
   0x5   : > { %p161_p3 = scmp.lt.s32.totalorder (!%p138_p2), %s519_s13, 3 }
   0x6   : > { %141 = sbr.rel (%p138_p2) target bundleno = 205 (0xcd), region = 32 }
   0xb   : > { %v528_v0 = vld [vmem:[%s748_s1 + $0x28] sm:$0xff]  ;;  %v549_v1 = vld [vmem:[%s748_s1 + $0x40] sm:$0xff]  ;;  %v548_v3 = vld [vmem:[%s748_s1 + $0x38] sm:$0xff]  ;;  %s752_s13 = smov (!%p161_p3, %s519_s13), 3  ;;  %vm196_vm0 = vcmask 195584   ;;  %vm454_vm1 = vcmask 72704  }
   0xc   : > { %v527_v2 = vld [vmem:[%s748_s1 + $0x20] sm:$0xff]  ;;  %561 = vmatpush.msra.mxu3 %v528_v0  ;;  %392 = vmatpush.msra.mxu2 %v549_v1  ;;  %v182_v4 = vld [vmem:[%s748_s1 + $0x10] sm:$0xff]  ;;  %v526_v5 = vld [vmem:[%s748_s1 + $0x18] sm:$0xff]  ;;  %s570_s5 = smul.u32 96, %s752_s13 }
   0xd   : > { %237 = vmatpush.msra.mxu0 %v528_v0  ;;  %308 = vmatpush.msra.mxu1 %v182_v4  ;;  %v547_v6 = vld [vmem:[%s748_s1 + $0x30] sm:$0xff]  ;;  %v181_v7 = vld [vmem:[%s748_s1 + $0x8] sm:$0xff]  ;;  %v180_v8 = vld [vmem:[%s748_s1] sm:$0xff]  ;;  %s571_s11 = smul.u32 72, %s752_s13 }
   0xe   : > { %562 = vmatpush.msra.mxu3 %v527_v2  ;;  %393 = vmatpush.msra.mxu2 %v548_v3  ;;  %s650_s8 = scalar_lea.vmem %s747_s0, %s570_s5  ;;  %v709_v39 = vld [vmem:[%s749_s2] ss:$0 sm:$0xff] }
   0xf   : > { %238 = vmatpush.msra.mxu0 %v527_v2  ;;  %309 = vmatpush.msra.mxu1 %v181_v7  ;;  %v190_v9 = vld [vmem:[%s650_s8 + $0x41] sm:$0xff]  ;;  %v339_v10 = vld [vmem:[%s650_s8 + $0x12] sm:$0xff]  ;;  %v183_v11 = vld [vmem:[%s650_s8 + $0x9] sm:$0xff]  ;;  %s716_s16 = scalar_lea.vmem %s750_s3, %s571_s11 }
  0x10   : > { %563 = vmatpush.msra.mxu3 %v526_v5  ;;  %394 = vmatpush.msra.mxu2 %v547_v6  ;;  %v171_v12 = vld [vmem:[%s650_s8] sm:$0xff]  ;;  %v191_v13 = vld [vmem:[%s650_s8 + $0x49] sm:$0xff]  ;;  %v184_v15 = vld [vmem:[%s650_s8 + $0x11] sm:$0xff] }
  0x11   : > { %239 = vmatpush.msra.mxu0 %v526_v5  ;;  %310 = vmatpush.msra.mxu1 %v180_v8  ;;  %v340_v14 = vld [vmem:[%s650_s8 + $0x1a] sm:$0xff]  ;;  %v172_v16 = vld [vmem:[%s650_s8 + $0x8] sm:$0xff]  ;;  %v173_v20 = vld [vmem:[%s650_s8 + $0x10] sm:$0xff] }
  0x12   : > { %564 = vmatpush.msrb.mxu3 %v182_v4  ;;  %550 = vmatmul.msk.f32.vlgmr.msra.gmra.mxu2 %vm196_vm0, %v339_v10  ;;  %v178_v17 = vld [vmem:[%s650_s8 + $0x38] sm:$0xff]  ;;  %v341_v18 = vld [vmem:[%s650_s8 + $0x22] sm:$0xff]  ;;  %v342_v22 = vld [vmem:[%s650_s8 + $0x2a] sm:$0xff] }
  0x13   : > { %536 = vmatmul.msk.f32.vlgmr.msra.gmra.mxu3 %vm196_vm0, %v190_v9  ;;  %529 = vmatmul.msk.f32.vlgmr.msra.gmra.mxu0 %vm196_vm0, %v183_v11  ;;  %v185_v19 = vld [vmem:[%s650_s8 + $0x19] sm:$0xff]  ;;  %v186_v23 = vld [vmem:[%s650_s8 + $0x21] sm:$0xff]  ;;  %v346_v26 = vld [vmem:[%s650_s8 + $0x4a] sm:$0xff] }
  0x14   : > { %538 = vmatmul.msk.f32.vlgmr.msra.gmra.mxu1 %vm196_vm0, %v171_v12  ;;  %565 = vmatpush.msrb.mxu3 %v181_v7  ;;  %v179_v21 = vld [vmem:[%s650_s8 + $0x40] sm:$0xff]  ;;  %v174_v24 = vld [vmem:[%s650_s8 + $0x18] sm:$0xff]  ;;  %v187_v27 = vld [vmem:[%s650_s8 + $0x29] sm:$0xff] }
  0x15   : > { %v343_v25 = vld [vmem:[%s650_s8 + $0x32] sm:$0xff]  ;;  %v175_v28 = vld [vmem:[%s650_s8 + $0x20] sm:$0xff]  ;;  %v176_v32 = vld [vmem:[%s650_s8 + $0x28] sm:$0xff] }
  0x16   : > { %566 = vmatpush.msrb.mxu3 %v180_v8  ;;  %v344_v29 = vld [vmem:[%s650_s8 + $0x3a] sm:$0xff]  ;;  %v347_v30 = vld [vmem:[%s650_s8 + $0x52] sm:$0xff]  ;;  %v345_v33 = vld [vmem:[%s650_s8 + $0x42] sm:$0xff] }
  0x17   : > { %v188_v31 = vld [vmem:[%s650_s8 + $0x31] sm:$0xff]  ;;  %v189_v34 = vld [vmem:[%s650_s8 + $0x39] sm:$0xff] }
  0x18   : > { %567 = vmatpush.msra.mxu3 %v549_v1  ;;  %v177_v35 = vld [vmem:[%s650_s8 + $0x30] sm:$0xff] }
  0x1a   : > { %568 = vmatpush.msra.mxu3 %v548_v3  ;;  %551 = vmatmul.msk.f32.gmra.mxu2 %vm196_vm0, %v340_v14 }
  0x1b   : > { %537 = vmatmul.msk.f32.gmra.mxu3 %vm196_vm0, %v191_v13  ;;  %530 = vmatmul.msk.f32.gmra.mxu0 %vm196_vm0, %v184_v15 }
  0x1c   : > { %539 = vmatmul.msk.f32.gmra.mxu1 %vm196_vm0, %v172_v16  ;;  %569 = vmatpush.msra.mxu3 %v547_v6 }
  0x22   : > { %552 = vmatmul.msk.f32.gmra.mxu2 %vm196_vm0, %v341_v18 }
  0x23   : > { %545 = vmatmul.msk.f32.vlgmr.msrb.gmra.mxu3 %vm196_vm0, %v178_v17  ;;  %531 = vmatmul.msk.f32.gmra.mxu0 %vm196_vm0, %v185_v19 }
  0x24   : > { %540 = vmatmul.msk.f32.gmra.mxu1 %vm196_vm0, %v173_v20 }
  0x2a   : > { %553 = vmatmul.msk.f32.gmra.mxu2 %vm196_vm0, %v342_v22 }
  0x2b   : > { %546 = vmatmul.msk.f32.gmra.mxu3 %vm196_vm0, %v179_v21  ;;  %532 = vmatmul.msk.f32.gmra.mxu0 %vm196_vm0, %v186_v23 }
  0x2c   : > { %541 = vmatmul.msk.f32.gmra.mxu1 %vm196_vm0, %v174_v24 }
  0x32   : > { %554 = vmatmul.msk.f32.gmra.mxu2 %vm196_vm0, %v343_v25 }
  0x33   : > { %557 = vmatmul.msk.f32.vlgmr.msra.gmra.mxu3 %vm196_vm0, %v346_v26  ;;  %533 = vmatmul.msk.f32.gmra.mxu0 %vm196_vm0, %v187_v27 }
  0x34   : > { %542 = vmatmul.msk.f32.gmra.mxu1 %vm196_vm0, %v175_v28 }
  0x3a   : > { %555 = vmatmul.msk.f32.gmra.mxu2 %vm196_vm0, %v344_v29 }
  0x3b   : > { %558 = vmatmul.msk.f32.gmra.mxu3 %vm196_vm0, %v347_v30  ;;  %534 = vmatmul.msk.f32.gmra.mxu0 %vm196_vm0, %v188_v31 }
  0x3c   : > { %543 = vmatmul.msk.f32.gmra.mxu1 %vm196_vm0, %v176_v32 }
  0x42   : > { %556 = vmatmul.msk.f32.gmra.mxu2 %vm196_vm0, %v345_v33 }
  0x43   : > { %535 = vmatmul.msk.f32.gmra.mxu0 %vm196_vm0, %v189_v34 }
  0x44   : > { %544 = vmatmul.msk.f32.gmra.mxu1 %vm196_vm0, %v177_v35 }
  0x90   : > { %v241_v36 = vpop.f32.mrf.mxu0 }
  0x91   : > { %v312_v37 = vpop.f32.mrf.mxu1 }
  0x92   : > { %v313_v38 = vadd.f32 %v312_v37, %v241_v36 }
  0x95   : > { %v396_v41 = vpop.f32.mrf.mxu2 }
  0x96   : > { %v262_v40 = vpop.f32.mrf.mxu3  ;;  %v423_v42 = vadd.f32 %v396_v41, %v313_v38 }
  0x98   : > { %v436_v43 = vadd.f32 %v709_v39, %v423_v42  ;;  %v244_v44 = vpop.f32.mrf.mxu0 }
  0x99   : > { %v315_v45 = vpop.f32.mrf.mxu1 }
  0x9a   : > { %v445_v46 = vmax.f32 %v436_v43, 0.0  ;;  %v316_v47 = vadd.f32 %v315_v45, %v244_v44 }
  0x9c   : > { %455 = vst.msk [vmem:[%s716_s16] sm:$0xff] %vm454_vm1, %v445_v46 }
  0x9d   : > { %v399_v49 = vpop.f32.mrf.mxu2 }
  0x9e   : > { %v265_v48 = vpop.f32.mrf.mxu3  ;;  %v424_v50 = vadd.f32 %v399_v49, %v316_v47 }
  0xa0   : > { %v437_v51 = vadd.f32 %v709_v39, %v424_v50  ;;  %v247_v52 = vpop.f32.mrf.mxu0 }
  0xa1   : > { %v318_v53 = vpop.f32.mrf.mxu1 }
  0xa2   : > { %v446_v54 = vmax.f32 %v437_v51, 0.0  ;;  %v319_v55 = vadd.f32 %v318_v53, %v247_v52 }
  0xa4   : > { %456 = vst.msk [vmem:[%s716_s16 + $0x8] sm:$0xff] %vm454_vm1, %v446_v54 }
  0xa5   : > { %v402_v57 = vpop.f32.mrf.mxu2 }
  0xa6   : > { %v333_v56 = vpop.f32.mrf.mxu3  ;;  %v425_v58 = vadd.f32 %v402_v57, %v319_v55 }
  0xa7   : > { %v334_v8 = vadd.f32 %v333_v56, %v262_v40 }
  0xa8   : > { %v438_v59 = vadd.f32 %v709_v39, %v425_v58  ;;  %v250_v60 = vpop.f32.mrf.mxu0 }
  0xa9   : > { %v321_v61 = vpop.f32.mrf.mxu1 }
  0xaa   : > { %v447_v62 = vmax.f32 %v438_v59, 0.0  ;;  %v322_v63 = vadd.f32 %v321_v61, %v250_v60 }
  0xac   : > { %457 = vst.msk [vmem:[%s716_s16 + $0x10] sm:$0xff] %vm454_vm1, %v447_v62 }
  0xad   : > { %v405_v1 = vpop.f32.mrf.mxu2 }
  0xae   : > { %v336_v0 = vpop.f32.mrf.mxu3  ;;  %v426_v2 = vadd.f32 %v405_v1, %v322_v63 }
  0xaf   : > { %v337_v20 = vadd.f32 %v336_v0, %v265_v48 }
  0xb0   : > { %v439_v3 = vadd.f32 %v709_v39, %v426_v2  ;;  %v253_v4 = vpop.f32.mrf.mxu0 }
  0xb1   : > { %v324_v5 = vpop.f32.mrf.mxu1 }
  0xb2   : > { %v448_v6 = vmax.f32 %v439_v3, 0.0  ;;  %v325_v7 = vadd.f32 %v324_v5, %v253_v4 }
  0xb4   : > { %458 = vst.msk [vmem:[%s716_s16 + $0x18] sm:$0xff] %vm454_vm1, %v448_v6 }
  0xb5   : > { %v408_v9 = vpop.f32.mrf.mxu2 }
  0xb6   : > { %v417_v10 = vpop.f32.mrf.mxu3  ;;  %v427_v11 = vadd.f32 %v408_v9, %v325_v7 }
  0xb7   : > { %v430_v12 = vadd.f32 %v417_v10, %v334_v8 }
  0xb8   : > { %v440_v13 = vadd.f32 %v709_v39, %v427_v11  ;;  %v256_v15 = vpop.f32.mrf.mxu0 }
  0xb9   : > { %v443_v14 = vadd.f32 %v709_v39, %v430_v12  ;;  %v327_v16 = vpop.f32.mrf.mxu1 }
  0xba   : > { %v449_v17 = vmax.f32 %v440_v13, 0.0  ;;  %v328_v19 = vadd.f32 %v327_v16, %v256_v15 }
  0xbb   : > { %v452_v18 = vmax.f32 %v443_v14, 0.0 }
  0xbc   : > { %459 = vst.msk [vmem:[%s716_s16 + $0x20] sm:$0xff] %vm454_vm1, %v449_v17 }
  0xbd   : > { %462 = vst.msk [vmem:[%s716_s16 + $0x38] sm:$0xff] %vm454_vm1, %v452_v18  ;;  %v411_v21 = vpop.f32.mrf.mxu2 }
  0xbe   : > { %v420_v22 = vpop.f32.mrf.mxu3  ;;  %v428_v23 = vadd.f32 %v411_v21, %v328_v19 }
  0xbf   : > { %v431_v24 = vadd.f32 %v420_v22, %v337_v20 }
  0xc0   : > { %v441_v25 = vadd.f32 %v709_v39, %v428_v23  ;;  %v259_v27 = vpop.f32.mrf.mxu0 }
  0xc1   : > { %v444_v26 = vadd.f32 %v709_v39, %v431_v24  ;;  %v330_v28 = vpop.f32.mrf.mxu1 }
  0xc2   : > { %v450_v29 = vmax.f32 %v441_v25, 0.0  ;;  %v331_v31 = vadd.f32 %v330_v28, %v259_v27 }
  0xc3   : > { %v453_v30 = vmax.f32 %v444_v26, 0.0 }
  0xc4   : > { %460 = vst.msk [vmem:[%s716_s16 + $0x28] sm:$0xff] %vm454_vm1, %v450_v29 }
  0xc5   : > { %463 = vst.msk [vmem:[%s716_s16 + $0x40] sm:$0xff] %vm454_vm1, %v453_v30  ;;  %v414_v32 = vpop.f32.mrf.mxu2 }
  0xc6   : > { %v429_v33 = vadd.f32 %v414_v32, %v331_v31 }
  0xc8   : > { %v442_v34 = vadd.f32 %v709_v39, %v429_v33 }
  0xca   : > { %v451_v35 = vmax.f32 %v442_v34, 0.0 }
  0xcc   : > { %461 = vst.msk [vmem:[%s716_s16 + $0x30] sm:$0xff] %vm454_vm1, %v451_v35 }
  0xcd PF: > { %s13_s12 = sadd.s32 1, %s587_s12  }
  0xce   : > { %p10_p4 = scmp.ge.s32.totalorder %s13_s12, 6  }
  0xd0   :  { %12 = sbr.rel (!%p10_p4) target bundleno = 1 (0x1), region = 64 }

// kernel: mixed_7a_forward.5
= control target key start
LH: loop header
LB: loop body
LE: loop exit
PB: predicated region body
PF: predicated region fallthrough
CT: control target
= control target key end

     0   :  { %s1623_s0 = inlined_call_operand.vmem [shape: f32[2,20,24], index: 0, kind: input, shape index: {}]   ;;  %s1624_s1 = inlined_call_operand.vmem [shape: f32[2,16,24], index: 1, kind: input, shape index: {}]   ;;  %s1625_s2 = inlined_call_operand.vmem [shape: f32[2,20,24], index: 2, kind: input, shape index: {}]   ;;  %s1626_s3 = inlined_call_operand.vmem [shape: f32[2,16,24], index: 3, kind: input, shape index: {}]   ;;  %s1627_s4 = inlined_call_operand.vmem [shape: f32[2,20,27], index: 4, kind: input, shape index: {}]   ;;  %s1628_s5 = inlined_call_operand.vmem [shape: f32[2,16,27], index: 5, kind: input, shape index: {}]   ;;  %s1629_s6 = inlined_call_operand.vmem [shape: f32[2,16,8], index: 6, kind: input, shape index: {}]   ;;  %s1630_s7 = inlined_call_operand.vmem [shape: f32[3,24,12], index: 7, kind: input, shape index: {}]   ;;  %s1631_s8 = inlined_call_operand.vmem [shape: f32[3,24,9], index: 8, kind: input, shape index: {}]   ;;  %s1632_s9 = inlined_call_operand.vmem [shape: f32[3,27,10], index: 9, kind: input, shape index: {}]   ;;  %s1633_s10 = inlined_call_operand.vmem [shape: f32[1,12], index: 10, kind: input, shape index: {}]   ;;  %s1634_s11 = inlined_call_operand.vmem [shape: f32[1,9], index: 11, kind: input, shape index: {}]   ;;  %s1635_s12 = inlined_call_operand.vmem [shape: f32[1,10], index: 12, kind: input, shape index: {}]   ;;  %s1636_s13 = inlined_call_operand.hbm [shape: f32[2,16,39], index: 13, kind: output, shape index: {}]  }
   0x1   :  { %1642 = sst [smem:[#allocation10_spill]] %s1623_s0 }
   0x2   :  { %18 = vsyncpa [#allocation3], 0 }
   0x3   :  { %20 = vsyncpa [#allocation3 + $0x1], 0  ;;  %s1361_s25 = smov 0   ;;  %s1363_s26 = smov 0  }
   0x4   :  { %s1365_s27 = smov 0   ;;  %s1367_s28 = smov 0  }
   0x5 LB: > { %1643 = sst [smem:[#allocation5_spill]] %s1272_s25  ;;  %s1382_s29 = sadd.s32 4294967295, %s1284_s28   ;;  %s1284_s28 = sphi %s1367_s28, %s1653_s28   ;;  %s1280_s27 = sphi %s1365_s27, %s1655_s27   ;;  %s1276_s26 = sphi %s1363_s26, %s1657_s26   ;;  %s1272_s25 = sphi %s1361_s25, %s1656_s25  }
   0x6   : > { %1644 = sst [smem:[#allocation6_spill]] %s1280_s27  ;;  %s1104_s30 = sadd.s32 4294967294, %s1284_s28  }
   0x7   : > { %s1386_s14 = sadd.s32 1, %s1284_s28   ;;  %s341_s15 = sadd.s32 1, %s1280_s27 }
   0x8   : > { %1645 = sst [smem:[#allocation7_spill]] %s1386_s14  ;;  %s338_s16 = ssub.s32 %s1284_s28, %s1386_s14 }
   0x9   : > { %p351_p0 = scmp.ne.s32.totalorder %s1280_s27, %s1276_s26  ;;  %p339_p1 = scmp.eq.s32.totalorder %s338_s16, 0 }
   0xa   : > { %p352_p2 = scmp.eq.s32.totalorder %s1382_s29, 1  ;;  %p357_p3 = scmp.ne.s32.totalorder %s1276_s26, %s1272_s25 }
   0xb   : > { %p358_p4 = scmp.eq.s32.totalorder %s1104_s30, 1  ;;  %p1107_p7 = scmp.ge.s32.totalorder %s1284_s28, 1 }
   0xc   : > { %s1397_s17 = scalar_select %p339_p1, %s1280_s27, %s341_s15  }
   0xd   : > { %p1399_p5 = por %p352_p2, %p351_p0  ;;  %p1403_p6 = por %p358_p4, %p357_p3 }
   0xe   : > { %1646 = sst [smem:[#allocation8_spill]] %s1397_s17  ;;  %p450_p8 = scmp.lt.s32.totalorder %s1284_s28, 3 }
   0xf   : > { %s1648_s19 = scalar_select %p1403_p6, 1, 0 }
  0x10   : > { %p451_p9 = pnand %p1107_p7, %p450_p8 }
  0x11   : > { %1649 = sst [smem:[#allocation9_spill]] %s1648_s19  ;;  %p524_p10 = scmp.lt.s32.totalorder (!%p451_p9), %s1382_s29, 1 }
  0x12   : > { %454 = sbr.rel (%p451_p9) target bundleno = 317 (0x13d), region = 72  ;;  %s1650_s0 = sld [smem:[#allocation10_spill]] (!%p451_p9) }
  0x13   : > { %s521_s17 = sand.u32 (!%p451_p9), 1, %s1276_s26  }
  0x17   : > { %v1122_v0 = vld [vmem:[%s1630_s7 + $0x28] sm:$0xff]  ;;  %v1129_v1 = vld [vmem:[%s1630_s7 + $0x40] sm:$0xff]  ;;  %v1128_v4 = vld [vmem:[%s1630_s7 + $0x38] sm:$0xff]  ;;  %s525_s24 = scalar_select %p524_p10, %s1382_s29, 1  ;;  %vm570_vm0 = vcmask 195584   ;;  %vm808_vm1 = vcmask 1042432  }
  0x18   : > { %v1134_v2 = vld [vmem:[%s1631_s8 + $0x28] sm:$0xff]  ;;  %590 = vmatpush.msra.mxu0 %v1122_v0  ;;  %1171 = vmatpush.msra.mxu1 %v1122_v0  ;;  %v1121_v3 = vld [vmem:[%s1630_s7 + $0x20] sm:$0xff]  ;;  %v1120_v6 = vld [vmem:[%s1630_s7 + $0x18] sm:$0xff]  ;;  %vm801_vm2 = vcmask 220160   ;;  %vm942_vm3 = vcmask 97280   ;;  %vm945_vm4 = vcmask 171008  }
  0x19   : > { %v1133_v5 = vld [vmem:[%s1631_s8 + $0x20] sm:$0xff]  ;;  %654 = vmatpush.msra.mxu2 %v1129_v1  ;;  %704 = vmatpush.msra.mxu3 %v1134_v2  ;;  %v563_v7 = vld [vmem:[%s1630_s7 + $0x10] sm:$0xff]  ;;  %s1438_s27 = sshll.u32 %s525_s24, 4  ;;  %s1440_s20 = smul.u32 24, %s525_s24  ;;  %v1132_v9 = vld [vmem:[%s1631_s8 + $0x18] sm:$0xff]  ;;  %vm948_vm5 = vcmask 252928  }
  0x1a   : > { %591 = vmatpush.msra.mxu0 %v1121_v3  ;;  %1172 = vmatpush.msra.mxu1 %v1121_v3  ;;  %v1127_v8 = vld [vmem:[%s1630_s7 + $0x30] sm:$0xff]  ;;  %s533_s23 = scalar_lea.vmem %s1624_s1, %s1438_s27  ;;  %s1453_s14 = scalar_lea.vmem %s1626_s3, %s1438_s27  ;;  %v1147_v15 = vld [vmem:[%s1632_s9 + $0x38] sm:$0x7]  ;;  %v562_v17 = vld [vmem:[%s1630_s7 + $0x8] sm:$0xff]  ;;  %vm951_vm6 = vcmask 318464  }
  0x1b   : > { %655 = vmatpush.msra.mxu2 %v1128_v4  ;;  %705 = vmatpush.msra.mxu3 %v1133_v5  ;;  %v678_v10 = vld [vmem:[%s1631_s8 + $0x10] sm:$0xff]  ;;  %v564_v11 = vld [vmem:[%s533_s23] sm:$0xff]  ;;  %v565_v12 = vld [vmem:[%s533_s23 + $0x8] sm:$0xff]  ;;  %s1462_s22 = scalar_lea.vmem %s1650_s0, %s1440_s20  ;;  %s1492_s15 = scalar_lea.vmem %s1625_s2, %s1440_s20 }
  0x1c   : > { %592 = vmatpush.msra.mxu0 %v1120_v6  ;;  %1173 = vmatpush.msra.mxu1 %v1120_v6  ;;  %v679_v13 = vld [vmem:[%s1453_s14] sm:$0xff]  ;;  %v793_v16 = vld [vmem:[%s1632_s9 + $0x18] sm:$0x7]  ;;  %v677_v18 = vld [vmem:[%s1631_s8 + $0x8] sm:$0xff]  ;;  %s553_s21 = scalar_lea.vmem %s1628_s5, %s1438_s27  ;;  %s548_s16 = scalar_lea.vmem %s1627_s4, %s1440_s20 }
  0x1d   : > { %656 = vmatpush.msra.mxu2 %v1127_v8  ;;  %1123 = vmatmul.msk.f32.vlgmr.msra.gmra.mxu0 %vm570_vm0, %v564_v11  ;;  %v629_v14 = vld [vmem:[%s1462_s22 + $0x4] sm:$0xff]  ;;  %v1146_v19 = vld [vmem:[%s1632_s9 + $0x30] sm:$0xff]  ;;  %v1157_v30 = vld [vmem:[%s1632_s9 + $0x58] sm:$0x7]  ;;  %s1286_s0 = smov 31   ;;  %s1288_s23 = smov 21  }
  0x1e   : > { %619 = vmatpush.msrb.mxu1 %v563_v7  ;;  %706 = vmatpush.msra.mxu3 %v1132_v9  ;;  %v792_v20 = vld [vmem:[%s1632_s9 + $0x10] sm:$0xff]  ;;  %v561_v21 = vld [vmem:[%s1630_s7] sm:$0xff]  ;;  %v1145_v24 = vld [vmem:[%s1632_s9 + $0x28] sm:$0xff]  ;;  %s1108_s24 = sshll.u32 %s521_s17, 4  ;;  %s1170_s20 = sshll.u32 %s1382_s29, 4 }
  0x1f   : > { %1124 = vmatmul.msk.f32.vlgmr.msra.gmra.mxu1 %vm570_vm0, %v565_v12  ;;  %1130 = vmatmul.msk.f32.vlgmr.msra.gmra.mxu2 %vm570_vm0, %v629_v14  ;;  %v676_v22 = vld [vmem:[%s1631_s8] sm:$0xff]  ;;  %v630_v27 = vld [vmem:[%s1462_s22 + $0xc] sm:$0xff]  ;;  %v1140_v34 = vld [vmem:[%s1631_s8 + $0x38] sm:$0xff]  ;;  %s955_s29 = scalar_lea.sflag [#allocation3], %s521_s17 }
  0x20   : > { %1135 = vmatmul.msk.f32.vlgmr.msra.gmra.mxu3 %vm570_vm0, %v679_v13  ;;  %733 = vmatpush.msrb.mxu0 %v678_v10  ;;  %v1141_v23 = vld [vmem:[%s1631_s8 + $0x40] sm:$0xff]  ;;  %v791_v28 = vld [vmem:[%s1632_s9 + $0x8] sm:$0xff]  ;;  %v1156_v33 = vld [vmem:[%s1632_s9 + $0x50] sm:$0xff] }
  0x21   : > { %1148 = vmatpush.msk.msrb.mxu2 %vm808_vm1, %v1147_v15  ;;  %1151 = vmatpush.msk.msrb.mxu3 %vm808_vm1, %v793_v16  ;;  %v559_v25 = vld [vmem:[%s1462_s22] sm:$0xff]  ;;  %v680_v29 = vld [vmem:[%s1453_s14 + $0x8] sm:$0xff]  ;;  %v1139_v36 = vld [vmem:[%s1631_s8 + $0x30] sm:$0xff]  ;;  %s1287_s14 = smov 12  }
  0x22   : > { %620 = vmatpush.msrb.mxu1 %v562_v17  ;;  %734 = vmatpush.msrb.mxu0 %v677_v18  ;;  %v674_v26 = vld [vmem:[%s1492_s15] sm:$0xff]  ;;  %v1155_v35 = vld [vmem:[%s1632_s9 + $0x48] sm:$0xff] }
  0x23   : > { %825 = vmatpush.msrb.mxu2 %v1146_v19  ;;  %857 = vmatpush.msrb.mxu3 %v792_v20  ;;  %v1144_v31 = vld [vmem:[%s1632_s9 + $0x20] sm:$0xff]  ;;  %v560_v37 = vld [vmem:[%s1462_s22 + $0x8] sm:$0xff] }
  0x24   : > { %621 = vmatpush.msrb.mxu1 %v561_v21  ;;  %735 = vmatpush.msrb.mxu0 %v676_v22  ;;  %v790_v32 = vld [vmem:[%s1632_s9] sm:$0xff]  ;;  %v675_v38 = vld [vmem:[%s1492_s15 + $0x8] sm:$0xff] }
  0x25   : > { %826 = vmatpush.msrb.mxu2 %v1145_v24  ;;  %1137 = vmatmul.msk.f32.vlgmr.msrb.gmra.mxu0 %vm570_vm0, %v674_v26  ;;  %v794_v39 = vld [vmem:[%s553_s21] sm:$0xff]  ;;  %v795_v44 = vld [vmem:[%s553_s21 + $0x8] sm:$0xff]  ;;  %s558_s21 = scalar_lea.vmem %s1629_s6, %s1438_s27  ;;  %s523_s27 = scalar_lea.vmem [#allocation2], %s1108_s24 }
  0x26   : > { %768 = vmatpush.msra.mxu1 %v1141_v23  ;;  %858 = vmatpush.msrb.mxu3 %v791_v28  ;;  %v1154_v40 = vld [vmem:[%s1632_s9 + $0x40] sm:$0xff]  ;;  %v789_v45 = vld [vmem:[%s548_s16 + $0x8] sm:$0xff] }
  0x27   : > { %1125 = vmatmul.msk.f32.vlgmr.msrb.gmra.mxu1 %vm570_vm0, %v559_v25  ;;  %1131 = vmatmul.msk.f32.gmra.mxu2 %vm570_vm0, %v630_v27  ;;  %v788_v41 = vld [vmem:[%s548_s16] sm:$0xff]  ;;  %v744_v46 = vld [vmem:[%s1492_s15 + $0xc] sm:$0xff] }
  0x28   : > { %1136 = vmatmul.msk.f32.gmra.mxu3 %vm570_vm0, %v680_v29  ;;  %1158 = vmatpush.msk.msra.mxu0 %vm808_vm1, %v1157_v30  ;;  %v743_v42 = vld [vmem:[%s1492_s15 + $0x4] sm:$0xff]  ;;  %v868_v47 = vld [vmem:[%s548_s16 + $0xc] sm:$0xff]  ;;  %v1220_v2 = vld [vmem:[%s1634_s11] ss:$0 sm:$0xff]  ;;  %s967_s15 = sshll.u32 %s523_s27, 4  ;;  %s968_s15 = int_to_ptr.vmem [resolvable:$true] %s967_s15 }
  0x29   : > { %827 = vmatpush.msrb.mxu2 %v1144_v31  ;;  %859 = vmatpush.msrb.mxu3 %v790_v32  ;;  %v867_v43 = vld [vmem:[%s548_s16 + $0x4] sm:$0xff]  ;;  %v1221_v8 = vld [vmem:[%s1635_s12] ss:$0 sm:$0xff]  ;;  %s1242_s16 = scalar_lea.hbm %s1636_s13, 32 }
  0x2a   : > { %896 = vmatpush.msra.mxu0 %v1156_v33  ;;  %769 = vmatpush.msra.mxu1 %v1140_v34  ;;  %v916_v55 = vld [vmem:[%s558_s21] sm:$0xff]  ;;  %v917_v58 = vld [vmem:[%s558_s21 + $0x8] sm:$0xff] }
  0x2b   : > { %936 = vrot.lane.b32.xlu2 %v916_v55, %s1286_s0  ;;  %v1219_v26 = vld [vmem:[%s1633_s10] ss:$0 sm:$0xff] }
  0x2c   : > { %897 = vmatpush.msra.mxu0 %v1155_v35  ;;  %770 = vmatpush.msra.mxu1 %v1139_v36 }
  0x2d   : > { %1138 = vmatmul.msk.f32.gmra.mxu0 %vm570_vm0, %v675_v38 }
  0x2e   : > { %898 = vmatpush.msra.mxu0 %v1154_v40 }
  0x2f   : > { %1126 = vmatmul.msk.f32.gmra.mxu1 %vm570_vm0, %v560_v37  ;;  %1149 = vmatmul.msk.f32.vlgmr.msrb.gmra.mxu2 %vm801_vm2, %v794_v39 }
  0x30   : > { %1152 = vmatmul.msk.f32.vlgmr.msrb.gmra.mxu3 %vm801_vm2, %v788_v41 }
  0x33   : > { %938 = vrot.lane.b32.xlu2 %v917_v58, %s1286_s0  ;;  %s966_s0 = scalar_lea.hbm %s1636_s13, %s1170_s20 }
  0x34   : > { %s969_s25 = sshll.u32 %s966_s0, 4  ;;  %s970_s25 = int_to_ptr.hbm [resolvable:$true] %s969_s25 }
  0x35   : > { %1159 = vmatmul.msk.f32.vlgmr.msra.gmra.mxu0 %vm801_vm2, %v867_v43  ;;  %s1236_s19 = sshra.s32 %s970_s25, 4  ;;  %s1237_s19 = int_to_ptr.hbm [resolvable:$true] %s1236_s19 }
  0x36   : > { %p1243_p0 = scmp.lt.s32.totalorder %s1237_s19, %s1636_s13 }
  0x37   : > { %1142 = vmatmul.msk.f32.vlgmr.msra.gmra.mxu1 %vm570_vm0, %v743_v42  ;;  %1150 = vmatmul.msk.f32.gmra.mxu2 %vm801_vm2, %v795_v44 }
  0x38   : > { %1153 = vmatmul.msk.f32.gmra.mxu3 %vm801_vm2, %v789_v45 }
  0x3d   : > { %1160 = vmatmul.msk.f32.gmra.mxu0 %vm801_vm2, %v868_v47 }
  0x3f   : > { %1143 = vmatmul.msk.f32.gmra.mxu1 %vm570_vm0, %v744_v46 }
  0x85   : > { %v937_v29 = vpop.permute.xlu2 %936 }
  0x8d   : > { %v939_v39 = vpop.permute.xlu2 %938 }
  0x9a   : > { %v594_v48 = vpop.f32.mrf.mxu0 }
  0x9c   : > { %v597_v49 = vpop.f32.mrf.mxu1 }
  0xa2   : > { %v658_v50 = vpop.f32.mrf.mxu2  ;;  %v737_v54 = vpop.f32.mrf.mxu0 }
  0xa3   : > { %v708_v51 = vpop.f32.mrf.mxu3 }
  0xa4   : > { %v623_v52 = vpop.f32.mrf.mxu1  ;;  %v738_v0 = vadd.f32 %v737_v54, %v708_v51 }
  0xa5   : > { %v624_v53 = vadd.f32 %v623_v52, %v594_v48 }
  0xa7   : > { %v664_v56 = vadd.f32 %v658_v50, %v624_v53 }
  0xa9   : > { %v670_v27 = vadd.f32 %v1219_v26, %v664_v56 }
  0xaa   : > { %v661_v57 = vpop.f32.mrf.mxu2  ;;  %v740_v62 = vpop.f32.mrf.mxu0 }
  0xab   : > { %v711_v59 = vpop.f32.mrf.mxu3  ;;  %v672_v28 = vmax.f32 %v670_v27, 0.0 }
  0xac   : > { %v626_v60 = vpop.f32.mrf.mxu1  ;;  %v741_v13 = vadd.f32 %v740_v62, %v711_v59 }
  0xad   : > { %v627_v61 = vadd.f32 %v626_v60, %v597_v49 }
  0xaf   : > { %v665_v63 = vadd.f32 %v661_v57, %v627_v61 }
  0xb1   : > { %v671_v33 = vadd.f32 %v1219_v26, %v665_v63 }
  0xb2   : > { %v829_v1 = vpop.f32.mrf.mxu2  ;;  %v900_v7 = vpop.f32.mrf.mxu0 }
  0xb3   : > { %v861_v3 = vpop.f32.mrf.mxu3  ;;  %v673_v36 = vmax.f32 %v671_v33, 0.0 }
  0xb4   : > { %v772_v4 = vpop.f32.mrf.mxu1  ;;  %v862_v5 = vadd.f32 %v861_v3, %v829_v1 }
  0xb5   : > { %v778_v6 = vadd.f32 %v772_v4, %v738_v0 }
  0xb6   : > { %v906_v9 = vadd.f32 %v900_v7, %v862_v5 }
  0xb7   : > { %v784_v10 = vadd.f32 %v1220_v2, %v778_v6 }
  0xb8   : > { %v912_v12 = vadd.f32 %v1221_v8, %v906_v9 }
  0xb9   : > { %v786_v11 = vmax.f32 %v784_v10, 0.0 }
  0xba   : > { %v832_v14 = vpop.f32.mrf.mxu2  ;;  %v914_v15 = vmax.f32 %v912_v12, 0.0  ;;  %v903_v20 = vpop.f32.mrf.mxu0 }
  0xbb   : > { %920 = vrot.lane.b32.xlu0 %v786_v11, %s1287_s14  ;;  %v864_v16 = vpop.f32.mrf.mxu3 }
  0xbc   : > { %v775_v17 = vpop.f32.mrf.mxu1  ;;  %v865_v18 = vadd.f32 %v864_v16, %v832_v14  ;;  %928 = vrot.lane.b32.xlu1 %v914_v15, %s1288_s23 }
  0xbd   : > { %v779_v19 = vadd.f32 %v775_v17, %v741_v13 }
  0xbe   : > { %v907_v22 = vadd.f32 %v903_v20, %v865_v18 }
  0xbf   : > { %v785_v21 = vadd.f32 %v1220_v2, %v779_v19 }
  0xc0   : > { %v913_v24 = vadd.f32 %v1221_v8, %v907_v22 }
  0xc1   : > { %v787_v23 = vmax.f32 %v785_v21, 0.0 }
  0xc2   : > { %v915_v25 = vmax.f32 %v913_v24, 0.0 }
  0xc3   : > { %922 = vrot.lane.b32.xlu0 %v787_v23, %s1287_s14  ;;  %s1238_s14 = scalar_lea.hbm %s1237_s19, 16 }
  0xc4   : > { %930 = vrot.lane.b32.xlu1 %v915_v25, %s1288_s23  ;;  %p1239_p11 = scmp.ne.s32.totalorder %s1237_s19, %s1238_s14  ;;  %p1244_p1 = scmp.lt.s32.totalorder %s1242_s16, %s1238_s14 }
  0xc6   : > { %p1240_p12 = pnand %p1239_p11, %p1399_p5  ;;  %p1245_p2 = por %p1244_p1, %p1243_p0 }
  0xc8   : > { %p1241_p13 = pneg %p1240_p12 }
  0xca   : > { %p1246_p3 = pnand %p1245_p2, %p1241_p13 }
 0x12d   : > { %v921_v30 = vpop.permute.xlu0 %920 }
 0x12e   : > { %v943_v31 = vsel %vm942_vm3, %v672_v28, %v921_v30  ;;  %v929_v32 = vpop.permute.xlu1 %928 }
 0x12f   : > { %v946_v34 = vsel %vm945_vm4, %v943_v31, %v929_v32 }
 0x130   : > { %v949_v35 = vsel %vm948_vm5, %v946_v34, %v937_v29 }
 0x131   : > { %952 = vst.msk [vmem:[%s523_s27] sm:$0xff] %vm951_vm6, %v949_v35 }
 0x135   : > { %v923_v37 = vpop.permute.xlu0 %922 }
 0x136   : > { %v944_v38 = vsel %vm942_vm3, %v673_v36, %v923_v37  ;;  %v931_v40 = vpop.permute.xlu1 %930 }
 0x137   : > { %v947_v41 = vsel %vm945_vm4, %v944_v38, %v931_v40 }
 0x138   : > { %v950_v42 = vsel %vm948_vm5, %v947_v41, %v939_v39 }
 0x139   : > { %953 = vst.msk [vmem:[%s523_s27 + $0x8] sm:$0xff] %vm951_vm6, %v950_v42 }
 0x13a   : > { %1249 = shalt.err (!%p1246_p3)
}
 0x13b   : > { %s1289_s17 = smov 128   ;;  %s1290_s22 = smov 8  }
 0x13c   : > { %1175 = dma.vmem_to_hbm [thread:$0]  (%p1399_p5), %s968_s15, 256, %s970_s25, %s955_s29, %s1289_s17, %s1289_s17, %s1290_s22  }
 0x13d PF: > { %s1651_s21 = sld [smem:[#allocation5_spill]]  ;;  %p1181_p4 = scmp.ge.s32.totalorder %s1284_s28, 2 }
 0x13f   : > { %p1178_p7 = pnand %p1181_p4, %p1403_p6 }
 0x141   : > { %p1179_p8 = pneg %p1178_p7 }
 0x143   : > { %s984_s27 = sand.u32 1, %s1651_s21  }
 0x144   : > { %s985_s23 = scalar_lea.sflag [#allocation3], %s984_s27 }
 0x145   : > { %1267 = dma.done.wait (%p1179_p8), %s985_s23, 256  }
 0x146   : > { %1269 = vsyncadd (%p1179_p8), %s985_s23, 4294967040  ;;  %s1653_s28 = sld [smem:[#allocation7_spill]]  ;;  %s1656_s25 = smov %s1276_s26 }
 0x147   : > { %s1654_s19 = sld [smem:[#allocation6_spill]] }
 0x148   : > { %s1655_s27 = sld [smem:[#allocation8_spill]] }
 0x14c   : > { %p23_p9 = scmp.ge.s32.totalorder %s1653_s28, 4  }
 0x14d   : > { %s1657_s26 = smov %s1654_s19 }
 0x14e   :  { %25 = sbr.rel (!%p23_p9) target bundleno = 5 (0x5), region = 131 }
 0x153   :  { %991 = vsyncpa [#allocation3], 1 }
 0x154   :  { %993 = vsyncpa [#allocation3 + $0x1], 1 }

</bundles_post_ra>
